<compile_context>
chip_gen: v6e
topology: v6e:2x2x1
jax: 0.10.0
libtpu: 0.0.40
codegen_flags: <defaults>
</compile_context>

<pallas_src>
import math

import jax
import jax.numpy as jnp
from jax import lax
from jax.experimental import pallas as pl
from jax.experimental.pallas import tpu as pltpu

TOKEN_DIM = 32          # cross_encoder_args['args']['input_f_size']
NUM_LANG_TOKENS = 8     # language sequence length after narr pooling


# ---------------------------------------------------------------------------
# Fused all-levels Pallas kernel
# ---------------------------------------------------------------------------
def _make_fused_kernel(n_levels):
    """Kernel ref layout:
         inputs : lang, then per level (patches, w_p2t, w_qk, w_vo, w_t2f_t)
         outputs: per level back_t (transposed, lane-dense), then lang_out
    """

    def kernel(*refs):
        lang_ref = refs[0]
        lvl_refs = refs[1:1 + 5 * n_levels]
        back_refs = refs[1 + 5 * n_levels:1 + 6 * n_levels]
        lang_out_ref = refs[1 + 6 * n_levels]

        B, L, D = lang_ref.shape
        scale = 1.0 / math.sqrt(D)
        bf16 = jnp.bfloat16

        lang = lang_ref[...]                                  # (B, L, D) f32
        lang2d = lang.reshape(B * L, D)

        def softmax(s):   # f32 elementwise (VPU); max/sum on XLU; reciprocal on EUP
            s = s - jnp.max(s, axis=-1, keepdims=True)
            p = jnp.exp(s)
            return p * pl.reciprocal(jnp.sum(p, axis=-1, keepdims=True), approx=True)

        for lv in range(n_levels):
            patches_ref, w_p2t_ref, w_qk_ref, w_vo_ref, w_t2f_t_ref = \
                lvl_refs[5 * lv:5 * lv + 5]
            BN, _ = patches_ref.shape
            N = BN // B
            last = (lv == n_levels - 1)

            # -- patches_to_token: Conv2d(k==stride, bias=False) == one matmul
            tokens = jnp.dot(patches_ref[...].astype(bf16), w_p2t_ref[...],
                             preferred_element_type=jnp.float32)      # (BN, D) f32

            # -- folded query projection q' = x @ (Wq Wk^T); on the last level the
            #    language rows ride along in the same MXU pass.
            x_all = (jnp.concatenate([tokens, lang2d], axis=0) if last else tokens)
            q_all = jnp.dot(x_all.astype(bf16), w_qk_ref[...],
                            preferred_element_type=jnp.float32)

            vis3 = tokens.reshape(B, N, D)
            vq = q_all[:BN].reshape(B, N, D)

            # visual tokens attend to language tokens
            s_vl = jnp.einsum('bnd,bld->bnl', vq, lang,
                              preferred_element_type=jnp.float32) * scale
            ctx_v = jnp.einsum('bnl,bld->bnd', softmax(s_vl), lang,
                               preferred_element_type=jnp.float32)    # (B, N, D)

            if last:
                # language tokens attend to visual tokens (only observable on the
                # final level: forward_language_f=False)
                lq = q_all[BN:].reshape(B, L, D)
                s_lv = jnp.einsum('bld,bnd->bln', lq, vis3,
                                  preferred_element_type=jnp.float32) * scale
                ctx_l = jnp.einsum('bln,bnd->bld', softmax(s_lv), vis3,
                                   preferred_element_type=jnp.float32)
                ctx_all = jnp.concatenate(
                    [ctx_v.reshape(BN, D), ctx_l.reshape(B * L, D)], axis=0)
            else:
                ctx_all = ctx_v.reshape(BN, D)

            # -- folded value/output projection (Wv Wo), one MXU pass
            o_all = jnp.dot(ctx_all.astype(bf16), w_vo_ref[...],
                            preferred_element_type=jnp.float32)

            fused_vis = tokens + o_all[:BN]                           # residual (BN, D)
            if last:
                lang_out_ref[...] = (lang2d + o_all[BN:]).reshape(B, L, D) \
                                        .astype(lang_out_ref.dtype)

            # -- tokens_to_features back-projection, emitted transposed:
            #    (pdim, BN) is lane-dense (last dim = 128) -> unmasked stores.
            back_t = lax.dot_general(w_t2f_t_ref[...], fused_vis.astype(bf16),
                                     (((1,), (1,)), ((), ())),
                                     preferred_element_type=jnp.float32)
            back_refs[lv][...] = back_t.astype(back_refs[lv].dtype)

    return kernel


def fused_cross_levels(lang, level_inputs):
    """ONE pallas_call for every FPN level; whole working set in a single block."""
    n_levels = len(level_inputs)
    B, L, D = lang.shape

    flat_inputs = [lang]
    out_shapes = []
    for (patches, w_p2t, w_qk, w_vo, w_t2f_t) in level_inputs:
        BN, pdim = patches.shape
        flat_inputs += [patches, w_p2t, w_qk, w_vo, w_t2f_t]
        out_shapes.append(jax.ShapeDtypeStruct((pdim, BN), jnp.float32))
    out_shapes.append(jax.ShapeDtypeStruct((B, L, D), jnp.float32))

    def full_spec(shape):
        return pl.BlockSpec(shape, lambda *_: (0,) * len(shape))

    return pl.pallas_call(
        _make_fused_kernel(n_levels),
        out_shape=tuple(out_shapes),
        grid=(1,),
        in_specs=[full_spec(x.shape) for x in flat_inputs],
        out_specs=tuple(full_spec(s.shape) for s in out_shapes),
        compiler_params=pltpu.CompilerParams(
            dimension_semantics=("arbitrary",)),
    )(*flat_inputs)


# ---------------------------------------------------------------------------
# JAX glue: patchify / unpatchify (pure reshape+transpose, single XLA copy each)
# TODO(synk): the NCHW patch regroup could be pulled into the kernel with
#             in-VMEM strided reads; kept in XLA glue (one fused copy under jit).
# ---------------------------------------------------------------------------
def patchify(x, ph, pw):
    # x: (B, C, H, W) NCHW -> (B*N, C*ph*pw); patch element order (c, u, v)
    # matches how Conv2d weight (D, C, ph, pw) flattens, so the matmul is
    # exactly the strided conv with kernel == stride, bias=False.
    B, C, H, W = x.shape
    hp, wp = H // ph, W // pw
    x = x.reshape(B, C, hp, ph, wp, pw)
    x = x.transpose(0, 2, 4, 1, 3, 5)          # (B, hp, wp, C, ph, pw)
    return x.reshape(B * hp * wp, C * ph * pw), (hp, wp)


def unpatchify(p, B, C, H, W, ph, pw):
    # p: (B*N, C*ph*pw) row-major (used by the pure-JAX reference)
    hp, wp = H // ph, W // pw
    x = p.reshape(B, hp, wp, C, ph, pw)
    x = x.transpose(0, 3, 1, 4, 2, 5)          # (B, C, hp, ph, wp, pw)
    return x.reshape(B, C, H, W)


def unpatchify_t(p_t, B, C, H, W, ph, pw):
    # p_t: (C*ph*pw, B*N) lane-dense kernel output; element order (c,u,v) x (b,hy,wx)
    hp, wp = H // ph, W // pw
    x = p_t.reshape(C, ph, pw, B, hp, wp)
    x = x.transpose(3, 0, 4, 1, 5, 2)          # (B, C, hp, ph, wp, pw)
    return x.reshape(B, C, H, W)


# ---------------------------------------------------------------------------
# Wrapper module (synthetic deterministic parameters)
# ---------------------------------------------------------------------------
class CrossFusionBoxWrapperPallas:
    """Pallas port of CrossFusionBoxWrapper's in-module compute:
       patches_to_token (Conv2d k==stride, bias=False) -> cross fusion encoder
       (visual<->language attention) -> tokens_to_features back-projection,
       all FPN levels fused into a single Pallas kernel launch.
    """

    def __init__(self, key, dsampled_shapes, in_rgb_channels,
                 patch_h, patch_w, token_dim=TOKEN_DIM):
        self.dsampled_shapes = dsampled_shapes
        self.in_rgb_channels = in_rgb_channels
        self.patch_h = patch_h
        self.patch_w = patch_w
        self.token_dim = token_dim

        self.w_p2t = []       # (C*ph*pw, D): patches_to_token Conv2d weight (flattened)
        self.attn_w = []      # unfused (wq, wk, wv, wo): kept for the f32 reference
        self.w_t2f = []       # (D, C*ph*pw): tokens_to_features linear
        # kernel-side weights (exact algebraic folds in f32, pre-cast to bf16):
        self.w_p2t_bf = []
        self.w_qk_bf = []     # Wq @ Wk^T   (folded query/key projection)
        self.w_vo_bf = []     # Wv @ Wo     (folded value/output projection)
        self.w_t2f_t_bf = []  # w_t2f^T so the back-projection is emitted lane-dense
        for i in range(len(dsampled_shapes)):
            c, ph, pw = in_rgb_channels[i], patch_h[i], patch_w[i]
            pdim = c * ph * pw
            keys = jax.random.split(jax.random.fold_in(key, i), 6)
            w_p2t = (jax.random.normal(keys[0], (pdim, token_dim), jnp.float32)
                     / math.sqrt(pdim))
            wq, wk, wv, wo = (jax.random.normal(keys[1 + j], (token_dim, token_dim),
                                                jnp.float32) / math.sqrt(token_dim)
                              for j in range(4))
            w_t2f = (jax.random.normal(keys[5], (token_dim, pdim), jnp.float32)
                     / math.sqrt(token_dim))
            self.w_p2t.append(w_p2t)
            self.attn_w.append((wq, wk, wv, wo))
            self.w_t2f.append(w_t2f)
            self.w_p2t_bf.append(w_p2t.astype(jnp.bfloat16))
            self.w_qk_bf.append((wq @ wk.T).astype(jnp.bfloat16))
            self.w_vo_bf.append((wv @ wo).astype(jnp.bfloat16))
            self.w_t2f_t_bf.append(w_t2f.T.astype(jnp.bfloat16))

    def forward(self, features, language_f):
        # TODO(synk): rcnn_model.forward_features/apply_fpn/apply_rpn_roi_on_features
        #             are an external detector; multi-scale features are passed in
        #             directly and the fused feature maps are returned.
        # TODO(synk): narr_pooling_layer / get_visual_token_mask / lm_layer /
        #             positional-embedding layers are external; language_f is taken
        #             pre-pooled and the 'global' mask (fully visible) is assumed.
        #             forward_language_f=False semantics: every level attends the
        #             ORIGINAL language_f; the last level's fused language features
        #             are returned.
        # TODO(synk): exact CrossTransformerModuleBox internals are not provided; a
        #             single-head bidirectional cross-attention block stands in.
        #             backproj_dropout is eval-mode identity.
        keys = sorted(features.keys())
        level_inputs, meta = [], []
        for i, key in enumerate(keys):
            x = features[key]                                  # (B, C, H, W)
            B, C, H, W = x.shape
            ph, pw = self.patch_h[i], self.patch_w[i]
            patches, _ = patchify(x, ph, pw)                   # (B*N, C*ph*pw)
            level_inputs.append((patches, self.w_p2t_bf[i], self.w_qk_bf[i],
                                 self.w_vo_bf[i], self.w_t2f_t_bf[i]))
            meta.append((key, B, C, H, W, ph, pw))

        *back_ts, fused_lang = fused_cross_levels(language_f, level_inputs)

        fused_features = {}
        for (key, B, C, H, W, ph, pw), back_t in zip(meta, back_ts):
            fused_features[key] = unpatchify_t(back_t, B, C, H, W, ph, pw)
        return fused_features, fused_lang

    # pure-JAX f32 reference (original, unfused weights) for correctness check
    def reference(self, features, language_f):
        def attend(q_in, kv_in, wq, wk, wv, wo):
            q = q_in @ wq
            k = kv_in @ wk
            v = kv_in @ wv
            s = (q @ jnp.swapaxes(k, -1, -2)) / math.sqrt(self.token_dim)
            p = jax.nn.softmax(s, axis=-1)
            return q_in + (p @ v) @ wo

        fused_features = {}
        fused_lang = language_f
        for i, key in enumerate(sorted(features.keys())):
            x = features[key]
            B, C, H, W = x.shape
            ph, pw = self.patch_h[i], self.patch_w[i]
            patches, (hp, wp) = patchify(x, ph, pw)
            vis = (patches @ self.w_p2t[i]).reshape(B, hp * wp, self.token_dim)
            wq, wk, wv, wo = self.attn_w[i]
            fused_vis = attend(vis, language_f, wq, wk, wv, wo)
            fused_lang = attend(language_f, vis, wq, wk, wv, wo)
            back = fused_vis.reshape(B * hp * wp, self.token_dim) @ self.w_t2f[i]
            fused_features[key] = unpatchify(back, B, C, H, W, ph, pw)
        return fused_features, fused_lang


if __name__ == "__main__":
    root = jax.random.PRNGKey(0)
    k_feat0, k_feat1, k_lang, k_param = jax.random.split(root, 4)

    B = 2
    dsampled_shapes = [(16, 16), (8, 8)]
    in_rgb_channels = [4, 8]
    patch_h = [2, 1]
    patch_w = [2, 1]

    features = {
        "0": jax.random.normal(k_feat0, (B, 4, 16, 16), jnp.float32),
        "1": jax.random.normal(k_feat1, (B, 8, 8, 8), jnp.float32),
    }
    language_f = jax.random.normal(k_lang, (B, NUM_LANG_TOKENS, TOKEN_DIM),
                                   jnp.float32)

    model = CrossFusionBoxWrapperPallas(
        k_param, dsampled_shapes, in_rgb_channels, patch_h, patch_w)

    fwd = jax.jit(model.forward)
    fused_feats, fused_lang = fwd(features, language_f)
    jax.block_until_ready((fused_feats, fused_lang))

    # correctness check against pure-JAX f32 reference (kernel uses bf16 MXU operands
    # with f32 accumulation, so allow a slightly wider absolute tolerance)
    ref_feats, ref_lang = model.reference(features, language_f)
    for key in features:
        assert fused_feats[key].shape == features[key].shape
        assert jnp.allclose(fused_feats[key], ref_feats[key],
                            rtol=2e-2, atol=2.5e-2), key
    assert jnp.allclose(fused_lang, ref_lang, rtol=2e-2, atol=2.5e-2)

    print("KERNEL_OK")
</pallas_src>

<mosaic_0001>
module attributes {stable_mosaic.version = 11 : i64} {
  func.func @kernel(%arg0: i32, %arg1: memref<2x8x32xf32, #tpu.memory_space<vmem>>, %arg2: memref<128x16xf32, #tpu.memory_space<vmem>>, %arg3: memref<16x32xbf16, #tpu.memory_space<vmem>>, %arg4: memref<32x32xbf16, #tpu.memory_space<vmem>>, %arg5: memref<32x32xbf16, #tpu.memory_space<vmem>>, %arg6: memref<16x32xbf16, #tpu.memory_space<vmem>>, %arg7: memref<128x8xf32, #tpu.memory_space<vmem>>, %arg8: memref<8x32xbf16, #tpu.memory_space<vmem>>, %arg9: memref<32x32xbf16, #tpu.memory_space<vmem>>, %arg10: memref<32x32xbf16, #tpu.memory_space<vmem>>, %arg11: memref<8x32xbf16, #tpu.memory_space<vmem>>, %arg12: memref<16x128xf32, #tpu.memory_space<vmem>>, %arg13: memref<8x128xf32, #tpu.memory_space<vmem>>, %arg14: memref<2x8x32xf32, #tpu.memory_space<vmem>>) attributes {dimension_semantics = [#tpu.dimension_semantics<arbitrary>], iteration_bounds = array<i64: 1>, scalar_prefetch = 0 : i64, scratch_operands = 0 : i64, tpu.core_type = #tpu.core_type<tc>, window_params = [{pipeline_mode = #tpu.pipeline_mode<synchronous>, transform_indices = @transform_0, window_bounds = array<i64: 2, 8, 32>}, {pipeline_mode = #tpu.pipeline_mode<synchronous>, transform_indices = @transform_1, window_bounds = array<i64: 128, 16>}, {pipeline_mode = #tpu.pipeline_mode<synchronous>, transform_indices = @transform_2, window_bounds = array<i64: 16, 32>}, {pipeline_mode = #tpu.pipeline_mode<synchronous>, transform_indices = @transform_3, window_bounds = array<i64: 32, 32>}, {pipeline_mode = #tpu.pipeline_mode<synchronous>, transform_indices = @transform_4, window_bounds = array<i64: 32, 32>}, {pipeline_mode = #tpu.pipeline_mode<synchronous>, transform_indices = @transform_5, window_bounds = array<i64: 16, 32>}, {pipeline_mode = #tpu.pipeline_mode<synchronous>, transform_indices = @transform_6, window_bounds = array<i64: 128, 8>}, {pipeline_mode = #tpu.pipeline_mode<synchronous>, transform_indices = @transform_7, window_bounds = array<i64: 8, 32>}, {pipeline_mode = #tpu.pipeline_mode<synchronous>, transform_indices = @transform_8, window_bounds = array<i64: 32, 32>}, {pipeline_mode = #tpu.pipeline_mode<synchronous>, transform_indices = @transform_9, window_bounds = array<i64: 32, 32>}, {pipeline_mode = #tpu.pipeline_mode<synchronous>, transform_indices = @transform_10, window_bounds = array<i64: 8, 32>}, {pipeline_mode = #tpu.pipeline_mode<synchronous>, transform_indices = @transform_11, window_bounds = array<i64: 16, 128>}, {pipeline_mode = #tpu.pipeline_mode<synchronous>, transform_indices = @transform_12, window_bounds = array<i64: 8, 128>}, {pipeline_mode = #tpu.pipeline_mode<synchronous>, transform_indices = @transform_13, window_bounds = array<i64: 2, 8, 32>}]} {
    %c0 = arith.constant 0 : index
    %c0_0 = arith.constant 0 : index
    %c0_1 = arith.constant 0 : index
    %0 = vector.load %arg1[%c0, %c0_0, %c0_1] : memref<2x8x32xf32, #tpu.memory_space<vmem>>, vector<2x8x32xf32>
    %1 = vector.shape_cast %0 : vector<2x8x32xf32> to vector<16x32xf32>
    %c0_2 = arith.constant 0 : index
    %c0_3 = arith.constant 0 : index
    %2 = vector.load %arg2[%c0_2, %c0_3] : memref<128x16xf32, #tpu.memory_space<vmem>>, vector<128x16xf32>
    %3 = arith.truncf %2 : vector<128x16xf32> to vector<128x16xbf16>
    %c0_4 = arith.constant 0 : index
    %c0_5 = arith.constant 0 : index
    %4 = vector.load %arg3[%c0_4, %c0_5] : memref<16x32xbf16, #tpu.memory_space<vmem>>, vector<16x32xbf16>
    %cst = arith.constant dense<0.000000e+00> : vector<128x32xf32>
    %5 = tpu.matmul %3, %4, %cst {dimension_numbers = #tpu.dot_dimension_numbers<[1], [0], [0], [1], [0, 0, 1, 1], [], []>} : vector<128x16xbf16>, vector<16x32xbf16>, vector<128x32xf32> -> vector<128x32xf32>
    %6 = arith.truncf %5 : vector<128x32xf32> to vector<128x32xbf16>
    %c0_6 = arith.constant 0 : index
    %c0_7 = arith.constant 0 : index
    %7 = vector.load %arg4[%c0_6, %c0_7] : memref<32x32xbf16, #tpu.memory_space<vmem>>, vector<32x32xbf16>
    %cst_8 = arith.constant dense<0.000000e+00> : vector<128x32xf32>
    %8 = tpu.matmul %6, %7, %cst_8 {dimension_numbers = #tpu.dot_dimension_numbers<[1], [0], [0], [1], [0, 0, 1, 1], [], []>} : vector<128x32xbf16>, vector<32x32xbf16>, vector<128x32xf32> -> vector<128x32xf32>
    %9 = vector.shape_cast %8 : vector<128x32xf32> to vector<2x64x32xf32>
    "tpu.trace_start"() <{level = 10 : i32, message = "bnd,bld->bnl"}> : () -> ()
    %cst_9 = arith.constant dense<0.000000e+00> : vector<2x64x8xf32>
    %10 = tpu.matmul %9, %0, %cst_9 {dimension_numbers = #tpu.dot_dimension_numbers<[2], [2], [1], [1], [0, 0, 0, 1, 1, 1], [0], [0]>} : vector<2x64x32xf32>, vector<2x8x32xf32>, vector<2x64x8xf32> -> vector<2x64x8xf32>
    "tpu.trace_stop"() : () -> ()
    %cst_10 = arith.constant 0.176776692 : f32
    %11 = vector.broadcast %cst_10 : f32 to vector<2x64x8xf32>
    %12 = arith.mulf %10, %11 : vector<2x64x8xf32>
    %cst_11 = arith.constant dense<0xFF800000> : vector<2x64xf32>
    %13 = vector.multi_reduction <maximumf>, %12, %cst_11 [2] : vector<2x64x8xf32> to vector<2x64xf32>
    %14 = vector.shape_cast %13 : vector<2x64xf32> to vector<2x64x1xf32>
    %15 = vector.broadcast %14 : vector<2x64x1xf32> to vector<2x64x8xf32>
    %16 = arith.subf %12, %15 : vector<2x64x8xf32>
    %17 = math.exp %16 : vector<2x64x8xf32>
    %cst_12 = arith.constant dense<0.000000e+00> : vector<2x64xf32>
    %18 = vector.multi_reduction <add>, %17, %cst_12 [2] : vector<2x64x8xf32> to vector<2x64xf32>
    %19 = vector.shape_cast %18 : vector<2x64xf32> to vector<2x64x1xf32>
    %20 = tpu.reciprocal %19 {approx = true} : vector<2x64x1xf32> -> vector<2x64x1xf32>
    %21 = vector.broadcast %20 : vector<2x64x1xf32> to vector<2x64x8xf32>
    %22 = arith.mulf %17, %21 : vector<2x64x8xf32>
    "tpu.trace_start"() <{level = 10 : i32, message = "bnl,bld->bnd"}> : () -> ()
    %cst_13 = arith.constant dense<0.000000e+00> : vector<2x64x32xf32>
    %23 = tpu.matmul %22, %0, %cst_13 {dimension_numbers = #tpu.dot_dimension_numbers<[2], [1], [1], [2], [0, 0, 0, 1, 1, 2], [0], [0]>} : vector<2x64x8xf32>, vector<2x8x32xf32>, vector<2x64x32xf32> -> vector<2x64x32xf32>
    "tpu.trace_stop"() : () -> ()
    %24 = vector.shape_cast %23 : vector<2x64x32xf32> to vector<128x32xf32>
    %25 = arith.truncf %24 : vector<128x32xf32> to vector<128x32xbf16>
    %c0_14 = arith.constant 0 : index
    %c0_15 = arith.constant 0 : index
    %26 = vector.load %arg5[%c0_14, %c0_15] : memref<32x32xbf16, #tpu.memory_space<vmem>>, vector<32x32xbf16>
    %cst_16 = arith.constant dense<0.000000e+00> : vector<128x32xf32>
    %27 = tpu.matmul %25, %26, %cst_16 {dimension_numbers = #tpu.dot_dimension_numbers<[1], [0], [0], [1], [0, 0, 1, 1], [], []>} : vector<128x32xbf16>, vector<32x32xbf16>, vector<128x32xf32> -> vector<128x32xf32>
    %28 = arith.addf %5, %27 : vector<128x32xf32>
    %c0_17 = arith.constant 0 : index
    %c0_18 = arith.constant 0 : index
    %29 = vector.load %arg6[%c0_17, %c0_18] : memref<16x32xbf16, #tpu.memory_space<vmem>>, vector<16x32xbf16>
    %30 = arith.truncf %28 : vector<128x32xf32> to vector<128x32xbf16>
    %cst_19 = arith.constant dense<0.000000e+00> : vector<16x128xf32>
    %31 = tpu.matmul %29, %30, %cst_19 {dimension_numbers = #tpu.dot_dimension_numbers<[1], [1], [0], [0], [0, 0, 1, 0], [], []>} : vector<16x32xbf16>, vector<128x32xbf16>, vector<16x128xf32> -> vector<16x128xf32>
    %c0_20 = arith.constant 0 : index
    %c0_21 = arith.constant 0 : index
    %32 = vector.load %arg12[%c0_20, %c0_21] : memref<16x128xf32, #tpu.memory_space<vmem>>, vector<16x128xf32>
    tpu.vector_store %arg12[%c0_20, %c0_21], %31 {strides = array<i32>} : memref<16x128xf32, #tpu.memory_space<vmem>>, vector<16x128xf32>,
    %c0_22 = arith.constant 0 : index
    %c0_23 = arith.constant 0 : index
    %33 = vector.load %arg7[%c0_22, %c0_23] : memref<128x8xf32, #tpu.memory_space<vmem>>, vector<128x8xf32>
    %34 = arith.truncf %33 : vector<128x8xf32> to vector<128x8xbf16>
    %c0_24 = arith.constant 0 : index
    %c0_25 = arith.constant 0 : index
    %35 = vector.load %arg8[%c0_24, %c0_25] : memref<8x32xbf16, #tpu.memory_space<vmem>>, vector<8x32xbf16>
    %cst_26 = arith.constant dense<0.000000e+00> : vector<128x32xf32>
    %36 = tpu.matmul %34, %35, %cst_26 {dimension_numbers = #tpu.dot_dimension_numbers<[1], [0], [0], [1], [0, 0, 1, 1], [], []>} : vector<128x8xbf16>, vector<8x32xbf16>, vector<128x32xf32> -> vector<128x32xf32>
    %37 = tpu.concatenate %36, %1 in 0 : vector<128x32xf32>, vector<16x32xf32> -> vector<144x32xf32>
    %38 = arith.truncf %37 : vector<144x32xf32> to vector<144x32xbf16>
    %c0_27 = arith.constant 0 : index
    %c0_28 = arith.constant 0 : index
    %39 = vector.load %arg9[%c0_27, %c0_28] : memref<32x32xbf16, #tpu.memory_space<vmem>>, vector<32x32xbf16>
    %cst_29 = arith.constant dense<0.000000e+00> : vector<144x32xf32>
    %40 = tpu.matmul %38, %39, %cst_29 {dimension_numbers = #tpu.dot_dimension_numbers<[1], [0], [0], [1], [0, 0, 1, 1], [], []>} : vector<144x32xbf16>, vector<32x32xbf16>, vector<144x32xf32> -> vector<144x32xf32>
    %41 = vector.shape_cast %36 : vector<128x32xf32> to vector<2x64x32xf32>
    %42 = vector.extract_strided_slice %40 {offsets = [0, 0], sizes = [128, 32], strides = [1, 1]} : vector<144x32xf32> to vector<128x32xf32>
    %43 = vector.shape_cast %42 : vector<128x32xf32> to vector<2x64x32xf32>
    "tpu.trace_start"() <{level = 10 : i32, message = "bnd,bld->bnl"}> : () -> ()
    %cst_30 = arith.constant dense<0.000000e+00> : vector<2x64x8xf32>
    %44 = tpu.matmul %43, %0, %cst_30 {dimension_numbers = #tpu.dot_dimension_numbers<[2], [2], [1], [1], [0, 0, 0, 1, 1, 1], [0], [0]>} : vector<2x64x32xf32>, vector<2x8x32xf32>, vector<2x64x8xf32> -> vector<2x64x8xf32>
    "tpu.trace_stop"() : () -> ()
    %cst_31 = arith.constant 0.176776692 : f32
    %45 = vector.broadcast %cst_31 : f32 to vector<2x64x8xf32>
    %46 = arith.mulf %44, %45 : vector<2x64x8xf32>
    %cst_32 = arith.constant dense<0xFF800000> : vector<2x64xf32>
    %47 = vector.multi_reduction <maximumf>, %46, %cst_32 [2] : vector<2x64x8xf32> to vector<2x64xf32>
    %48 = vector.shape_cast %47 : vector<2x64xf32> to vector<2x64x1xf32>
    %49 = vector.broadcast %48 : vector<2x64x1xf32> to vector<2x64x8xf32>
    %50 = arith.subf %46, %49 : vector<2x64x8xf32>
    %51 = math.exp %50 : vector<2x64x8xf32>
    %cst_33 = arith.constant dense<0.000000e+00> : vector<2x64xf32>
    %52 = vector.multi_reduction <add>, %51, %cst_33 [2] : vector<2x64x8xf32> to vector<2x64xf32>
    %53 = vector.shape_cast %52 : vector<2x64xf32> to vector<2x64x1xf32>
    %54 = tpu.reciprocal %53 {approx = true} : vector<2x64x1xf32> -> vector<2x64x1xf32>
    %55 = vector.broadcast %54 : vector<2x64x1xf32> to vector<2x64x8xf32>
    %56 = arith.mulf %51, %55 : vector<2x64x8xf32>
    "tpu.trace_start"() <{level = 10 : i32, message = "bnl,bld->bnd"}> : () -> ()
    %cst_34 = arith.constant dense<0.000000e+00> : vector<2x64x32xf32>
    %57 = tpu.matmul %56, %0, %cst_34 {dimension_numbers = #tpu.dot_dimension_numbers<[2], [1], [1], [2], [0, 0, 0, 1, 1, 2], [0], [0]>} : vector<2x64x8xf32>, vector<2x8x32xf32>, vector<2x64x32xf32> -> vector<2x64x32xf32>
    "tpu.trace_stop"() : () -> ()
    %58 = vector.extract_strided_slice %40 {offsets = [128, 0], sizes = [16, 32], strides = [1, 1]} : vector<144x32xf32> to vector<16x32xf32>
    %59 = vector.shape_cast %58 : vector<16x32xf32> to vector<2x8x32xf32>
    "tpu.trace_start"() <{level = 10 : i32, message = "bld,bnd->bln"}> : () -> ()
    %cst_35 = arith.constant dense<0.000000e+00> : vector<2x8x64xf32>
    %60 = tpu.matmul %59, %41, %cst_35 {dimension_numbers = #tpu.dot_dimension_numbers<[2], [2], [1], [1], [0, 0, 0, 1, 1, 1], [0], [0]>} : vector<2x8x32xf32>, vector<2x64x32xf32>, vector<2x8x64xf32> -> vector<2x8x64xf32>
    "tpu.trace_stop"() : () -> ()
    %cst_36 = arith.constant 0.176776692 : f32
    %61 = vector.broadcast %cst_36 : f32 to vector<2x8x64xf32>
    %62 = arith.mulf %60, %61 : vector<2x8x64xf32>
    %cst_37 = arith.constant dense<0xFF800000> : vector<2x8xf32>
    %63 = vector.multi_reduction <maximumf>, %62, %cst_37 [2] : vector<2x8x64xf32> to vector<2x8xf32>
    %64 = vector.shape_cast %63 : vector<2x8xf32> to vector<2x8x1xf32>
    %65 = vector.broadcast %64 : vector<2x8x1xf32> to vector<2x8x64xf32>
    %66 = arith.subf %62, %65 : vector<2x8x64xf32>
    %67 = math.exp %66 : vector<2x8x64xf32>
    %cst_38 = arith.constant dense<0.000000e+00> : vector<2x8xf32>
    %68 = vector.multi_reduction <add>, %67, %cst_38 [2] : vector<2x8x64xf32> to vector<2x8xf32>
    %69 = vector.shape_cast %68 : vector<2x8xf32> to vector<2x8x1xf32>
    %70 = tpu.reciprocal %69 {approx = true} : vector<2x8x1xf32> -> vector<2x8x1xf32>
    %71 = vector.broadcast %70 : vector<2x8x1xf32> to vector<2x8x64xf32>
    %72 = arith.mulf %67, %71 : vector<2x8x64xf32>
    "tpu.trace_start"() <{level = 10 : i32, message = "bln,bnd->bld"}> : () -> ()
    %cst_39 = arith.constant dense<0.000000e+00> : vector<2x8x32xf32>
    %73 = tpu.matmul %72, %41, %cst_39 {dimension_numbers = #tpu.dot_dimension_numbers<[2], [1], [1], [2], [0, 0, 0, 1, 1, 2], [0], [0]>} : vector<2x8x64xf32>, vector<2x64x32xf32>, vector<2x8x32xf32> -> vector<2x8x32xf32>
    "tpu.trace_stop"() : () -> ()
    %74 = vector.shape_cast %57 : vector<2x64x32xf32> to vector<128x32xf32>
    %75 = vector.shape_cast %73 : vector<2x8x32xf32> to vector<16x32xf32>
    %76 = tpu.concatenate %74, %75 in 0 : vector<128x32xf32>, vector<16x32xf32> -> vector<144x32xf32>
    %77 = arith.truncf %76 : vector<144x32xf32> to vector<144x32xbf16>
    %c0_40 = arith.constant 0 : index
    %c0_41 = arith.constant 0 : index
    %78 = vector.load %arg10[%c0_40, %c0_41] : memref<32x32xbf16, #tpu.memory_space<vmem>>, vector<32x32xbf16>
    %cst_42 = arith.constant dense<0.000000e+00> : vector<144x32xf32>
    %79 = tpu.matmul %77, %78, %cst_42 {dimension_numbers = #tpu.dot_dimension_numbers<[1], [0], [0], [1], [0, 0, 1, 1], [], []>} : vector<144x32xbf16>, vector<32x32xbf16>, vector<144x32xf32> -> vector<144x32xf32>
    %80 = vector.extract_strided_slice %79 {offsets = [0, 0], sizes = [128, 32], strides = [1, 1]} : vector<144x32xf32> to vector<128x32xf32>
    %81 = arith.addf %36, %80 : vector<128x32xf32>
    %82 = vector.extract_strided_slice %79 {offsets = [128, 0], sizes = [16, 32], strides = [1, 1]} : vector<144x32xf32> to vector<16x32xf32>
    %83 = arith.addf %1, %82 : vector<16x32xf32>
    %84 = vector.shape_cast %83 : vector<16x32xf32> to vector<2x8x32xf32>
    %c0_43 = arith.constant 0 : index
    %c0_44 = arith.constant 0 : index
    %c0_45 = arith.constant 0 : index
    %85 = vector.load %arg14[%c0_43, %c0_44, %c0_45] : memref<2x8x32xf32, #tpu.memory_space<vmem>>, vector<2x8x32xf32>
    tpu.vector_store %arg14[%c0_43, %c0_44, %c0_45], %84 {strides = array<i32>} : memref<2x8x32xf32, #tpu.memory_space<vmem>>, vector<2x8x32xf32>,
    %c0_46 = arith.constant 0 : index
    %c0_47 = arith.constant 0 : index
    %86 = vector.load %arg11[%c0_46, %c0_47] : memref<8x32xbf16, #tpu.memory_space<vmem>>, vector<8x32xbf16>
    %87 = arith.truncf %81 : vector<128x32xf32> to vector<128x32xbf16>
    %cst_48 = arith.constant dense<0.000000e+00> : vector<8x128xf32>
    %88 = tpu.matmul %86, %87, %cst_48 {dimension_numbers = #tpu.dot_dimension_numbers<[1], [1], [0], [0], [0, 0, 1, 0], [], []>} : vector<8x32xbf16>, vector<128x32xbf16>, vector<8x128xf32> -> vector<8x128xf32>
    %c0_49 = arith.constant 0 : index
    %c0_50 = arith.constant 0 : index
    %89 = vector.load %arg13[%c0_49, %c0_50] : memref<8x128xf32, #tpu.memory_space<vmem>>, vector<8x128xf32>
    tpu.vector_store %arg13[%c0_49, %c0_50], %88 {strides = array<i32>} : memref<8x128xf32, #tpu.memory_space<vmem>>, vector<8x128xf32>,
    return
  }
  func.func @transform_0(%arg0: i32) -> (i32, i32, i32) {
    %c0_i32 = arith.constant 0 : i32
    %c0_i32_0 = arith.constant 0 : i32
    %c0_i32_1 = arith.constant 0 : i32
    %c0_i32_2 = arith.constant 0 : i32
    return %c0_i32, %c0_i32_0, %c0_i32_1 : i32, i32, i32
  }
  func.func @transform_1(%arg0: i32) -> (i32, i32) {
    %c0_i32 = arith.constant 0 : i32
    %c0_i32_0 = arith.constant 0 : i32
    %c0_i32_1 = arith.constant 0 : i32
    return %c0_i32, %c0_i32_0 : i32, i32
  }
  func.func @transform_2(%arg0: i32) -> (i32, i32) {
    %c0_i32 = arith.constant 0 : i32
    %c0_i32_0 = arith.constant 0 : i32
    %c0_i32_1 = arith.constant 0 : i32
    return %c0_i32, %c0_i32_0 : i32, i32
  }
  func.func @transform_3(%arg0: i32) -> (i32, i32) {
    %c0_i32 = arith.constant 0 : i32
    %c0_i32_0 = arith.constant 0 : i32
    %c0_i32_1 = arith.constant 0 : i32
    return %c0_i32, %c0_i32_0 : i32, i32
  }
  func.func @transform_4(%arg0: i32) -> (i32, i32) {
    %c0_i32 = arith.constant 0 : i32
    %c0_i32_0 = arith.constant 0 : i32
    %c0_i32_1 = arith.constant 0 : i32
    return %c0_i32, %c0_i32_0 : i32, i32
  }
  func.func @transform_5(%arg0: i32) -> (i32, i32) {
    %c0_i32 = arith.constant 0 : i32
    %c0_i32_0 = arith.constant 0 : i32
    %c0_i32_1 = arith.constant 0 : i32
    return %c0_i32, %c0_i32_0 : i32, i32
  }
  func.func @transform_6(%arg0: i32) -> (i32, i32) {
    %c0_i32 = arith.constant 0 : i32
    %c0_i32_0 = arith.constant 0 : i32
    %c0_i32_1 = arith.constant 0 : i32
    return %c0_i32, %c0_i32_0 : i32, i32
  }
  func.func @transform_7(%arg0: i32) -> (i32, i32) {
    %c0_i32 = arith.constant 0 : i32
    %c0_i32_0 = arith.constant 0 : i32
    %c0_i32_1 = arith.constant 0 : i32
    return %c0_i32, %c0_i32_0 : i32, i32
  }
  func.func @transform_8(%arg0: i32) -> (i32, i32) {
    %c0_i32 = arith.constant 0 : i32
    %c0_i32_0 = arith.constant 0 : i32
    %c0_i32_1 = arith.constant 0 : i32
    return %c0_i32, %c0_i32_0 : i32, i32
  }
  func.func @transform_9(%arg0: i32) -> (i32, i32) {
    %c0_i32 = arith.constant 0 : i32
    %c0_i32_0 = arith.constant 0 : i32
    %c0_i32_1 = arith.constant 0 : i32
    return %c0_i32, %c0_i32_0 : i32, i32
  }
  func.func @transform_10(%arg0: i32) -> (i32, i32) {
    %c0_i32 = arith.constant 0 : i32
    %c0_i32_0 = arith.constant 0 : i32
    %c0_i32_1 = arith.constant 0 : i32
    return %c0_i32, %c0_i32_0 : i32, i32
  }
  func.func @transform_11(%arg0: i32) -> (i32, i32) {
    %c0_i32 = arith.constant 0 : i32
    %c0_i32_0 = arith.constant 0 : i32
    %c0_i32_1 = arith.constant 0 : i32
    return %c0_i32, %c0_i32_0 : i32, i32
  }
  func.func @transform_12(%arg0: i32) -> (i32, i32) {
    %c0_i32 = arith.constant 0 : i32
    %c0_i32_0 = arith.constant 0 : i32
    %c0_i32_1 = arith.constant 0 : i32
    return %c0_i32, %c0_i32_0 : i32, i32
  }
  func.func @transform_13(%arg0: i32) -> (i32, i32, i32) {
    %c0_i32 = arith.constant 0 : i32
    %c0_i32_0 = arith.constant 0 : i32
    %c0_i32_1 = arith.constant 0 : i32
    %c0_i32_2 = arith.constant 0 : i32
    return %c0_i32, %c0_i32_0, %c0_i32_1 : i32, i32, i32
  }
}

</mosaic_0001>

<bundles_post_ra>
// kernel: forward.1
= control target key start
LH: loop header
LB: loop body
LE: loop exit
PB: predicated region body
PF: predicated region fallthrough
CT: control target
= control target key end

     0   :  { %vm77_vm0 = vcmask 130048   ;;  %s4897_s0 = inlined_call_operand.vmem [shape: f32[2,8,32], index: 0, kind: input, shape index: {}]   ;;  %s4898_s1 = inlined_call_operand.vmem [shape: f32[128,16], index: 1, kind: input, shape index: {}]   ;;  %s4899_s2 = inlined_call_operand.vmem [shape: bf16[16,32], index: 2, kind: input, shape index: {}]   ;;  %s4900_s3 = inlined_call_operand.vmem [shape: bf16[32,32], index: 3, kind: input, shape index: {}]   ;;  %s4901_s4 = inlined_call_operand.vmem [shape: bf16[32,32], index: 4, kind: input, shape index: {}]   ;;  %s4902_s5 = inlined_call_operand.vmem [shape: bf16[16,32], index: 5, kind: input, shape index: {}]   ;;  %s4903_s6 = inlined_call_operand.vmem [shape: f32[128,8], index: 6, kind: input, shape index: {}]   ;;  %s4904_s7 = inlined_call_operand.vmem [shape: bf16[8,32], index: 7, kind: input, shape index: {}]   ;;  %s4905_s8 = inlined_call_operand.vmem [shape: bf16[32,32], index: 8, kind: input, shape index: {}]   ;;  %s4906_s9 = inlined_call_operand.vmem [shape: bf16[32,32], index: 9, kind: input, shape index: {}]   ;;  %s4907_s10 = inlined_call_operand.vmem [shape: bf16[8,32], index: 10, kind: input, shape index: {}]   ;;  %s4908_s11 = inlined_call_operand.vmem [shape: f32[16,128], index: 11, kind: output, shape index: {0}]   ;;  %s4909_s12 = inlined_call_operand.vmem [shape: f32[8,128], index: 12, kind: output, shape index: {1}]   ;;  %s4910_s13 = inlined_call_operand.hbm [shape: f32[2,8,32], index: 13, kind: output, shape index: {2}]  }
   0x1   :  { %v3690_v0 = vld [vmem:[%s4899_s2] sm:$0xff]   ;;  %v46_v2 = vld [vmem:[%s4898_s1 + $0x8] sm:$0xff]  ;;  %v47_v3 = vld [vmem:[%s4898_s1 + $0x10] sm:$0xff] }
   0x2   :  { %v45_v1 = vld [vmem:[%s4898_s1] sm:$0xff]  ;;  %3300 = vmatprep.subr.bf16.mxu0 %v3690_v0  ;;  %v48_v5 = vld [vmem:[%s4898_s1 + $0x18] sm:$0xff]  ;;  %v50_v7 = vld [vmem:[%s4898_s1 + $0x28] sm:$0xff] }
   0x3   :  { %v61_v4 = vpack.c.bf16 %v46_v2, %v45_v1  ;;  %v49_v6 = vld [vmem:[%s4898_s1 + $0x20] sm:$0xff]  ;;  %3301 = vmatpush3.bf16.msra.mxu0 %v3690_v0  ;;  %v62_v8 = vpack.c.bf16 %v48_v5, %v47_v3  ;;  %v51_v10 = vld [vmem:[%s4898_s1 + $0x30] sm:$0xff]  ;;  %v52_v11 = vld [vmem:[%s4898_s1 + $0x38] sm:$0xff] }
   0x4   :  { %v63_v9 = vpack.c.bf16 %v50_v7, %v49_v6  ;;  %v53_v12 = vld [vmem:[%s4898_s1 + $0x40] sm:$0xff]  ;;  %v54_v13 = vld [vmem:[%s4898_s1 + $0x48] sm:$0xff]  ;;  %v64_v14 = vpack.c.bf16 %v52_v11, %v51_v10 }
   0x5   :  { %3302 = vmatprep.mubr.msk.bf16.mxu0 %vm77_vm0, %v61_v4  ;;  %v65_v15 = vpack.c.bf16 %v54_v13, %v53_v12 }
   0x6   :  { %3303 = vmatmul.mubr.msk.bf16.vlgmr.msra.gmra.mxu0 %vm77_vm0, %v62_v8 }
   0x7   :  { %3306 = vmatprep.mubr.msk.bf16.mxu0 %vm77_vm0, %v63_v9 }
   0x8   :  { %19 = vsyncpa [#allocation3], 0  ;;  %v55_v16 = vld [vmem:[%s4898_s1 + $0x50] sm:$0xff]  ;;  %v56_v17 = vld [vmem:[%s4898_s1 + $0x58] sm:$0xff]  ;;  %vm223_vm1 = vcmask 261120   ;;  %vm625_vm2 = vcmask 64512  }
   0x9   :  { %v57_v18 = vld [vmem:[%s4898_s1 + $0x60] sm:$0xff]  ;;  %v58_v19 = vld [vmem:[%s4898_s1 + $0x68] sm:$0xff]  ;;  %v66_v20 = vpack.c.bf16 %v56_v17, %v55_v16  ;;  %v59_v22 = vld [vmem:[%s4898_s1 + $0x70] sm:$0xff]  ;;  %vm1355_vm3 = vcmask 1043456   ;;  %vm3863_vm4 = vmmov 0   ;;  %vm2517_vm5 = vcmask 523264  }
   0xa   :  { %v67_v21 = vpack.c.bf16 %v58_v19, %v57_v18  ;;  %v60_v23 = vld [vmem:[%s4898_s1 + $0x78] sm:$0xff]  ;;  %v3691_v25 = vld [vmem:[%s4900_s3 + $0x8] sm:$0xff]   ;;  %v3692_v26 = vld [vmem:[%s4900_s3] sm:$0xff]  }
   0xb   :  { %v68_v24 = vpack.c.bf16 %v60_v23, %v59_v22  ;;  %3318 = vmatprep.subr.bf16.mxu1 %v3691_v25  ;;  %v4005_v27 = vld [vmem:[%s4897_s0] sm:$0xff]  ;;  %v4010_v28 = vld [vmem:[%s4897_s0 + $0x8] sm:$0xff] }
   0xc   :  { %3319 = vmatpush3.bf16.msra.mxu1 %v3691_v25  ;;  %3338 = vmatprep.subr.msk.mxu0 %vm223_vm1, %v4005_v27 }
   0xd   :  { %3320 = vmatprep.subr.bf16.mxu1 %v3692_v26  ;;  %3339 = vmatpush3.xpose.msk.msra.mxu0 %vm223_vm1, %v4005_v27 }
   0xe   :  { %3307 = vmatmul.mubr.msk.bf16.gmra.mxu0 %vm77_vm0, %v64_v14  ;;  %3366 = vmatprep.subr.mxu0 %v4005_v27 }
   0xf   :  { %3310 = vmatprep.mubr.msk.bf16.mxu0 %vm77_vm0, %v65_v15 }
  0x10   :  { %3321 = vmatpush3.bf16.msra.mxu1 %v3692_v26 }
  0x11   :  { %3352 = vmatprep.subr.msk.mxu1 %vm223_vm1, %v4010_v28 }
  0x16   :  { %3311 = vmatmul.mubr.msk.bf16.gmra.mxu0 %vm77_vm0, %v66_v20 }
  0x17   :  { %3314 = vmatprep.mubr.msk.bf16.mxu0 %vm77_vm0, %v67_v21 }
  0x1e   :  { %3315 = vmatmul.mubr.msk.bf16.gmra.mxu0 %vm77_vm0, %v68_v24 }
  0xc6   :  { %v4019_v29 = vpop.f32.mrf.mxu0 }
  0xc8   :  { %v4021_v30 = vpop.f32.mrf.mxu0 }
  0xca   :  { %v4023_v31 = vpop.f32.mrf.mxu0 }
  0xcb   :  { %v200_v34 = vpack.c.bf16 %v4023_v31, %v4019_v29 }
  0xcc   :  { %v4025_v32 = vpop.f32.mrf.mxu0 }
  0xcd   :  { %v199_v33 = vpack.c.bf16 %v4025_v32, %v4021_v30 }
  0xce   :  { %v4031_v35 = vpop.f32.mrf.mxu0 }
  0xcf   :  { %3322 = vmatprep.mubr.msk.bf16.mxu1 %vm223_vm1, %v199_v33 }
  0xd0   :  { %v4034_v36 = vpop.f32.mrf.mxu0  ;;  %3323 = vmatmul.mubr.msk.bf16.vlgmr.msra.gmra.mxu1 %vm223_vm1, %v200_v34 }
  0xd1   :  { %3353 = vmatpush3.xpose.msk.msra.mxu1 %vm223_vm1, %v4010_v28 }
  0xd2   :  { %v4039_v37 = vpop.f32.mrf.mxu0  ;;  %3380 = vmatprep.subr.mxu1 %v4010_v28 }
  0xd3   :  { %v202_v40 = vpack.c.bf16 %v4039_v37, %v4031_v35 }
  0xd4   :  { %v4042_v38 = vpop.f32.mrf.mxu0 }
  0xd5   :  { %v201_v39 = vpack.c.bf16 %v4042_v38, %v4034_v36 }
  0xd6   :  { %v4048_v41 = vpop.f32.mrf.mxu0 }
  0xd7   :  { %3326 = vmatprep.mubr.msk.bf16.mxu1 %vm223_vm1, %v201_v39 }
  0xd8   :  { %v4051_v42 = vpop.f32.mrf.mxu0  ;;  %3327 = vmatmul.mubr.msk.bf16.gmra.mxu1 %vm223_vm1, %v202_v40 }
  0xda   :  { %v4054_v43 = vpop.f32.mrf.mxu0 }
  0xdb   :  { %v204_v46 = vpack.c.bf16 %v4054_v43, %v4048_v41 }
  0xdc   :  { %v4056_v44 = vpop.f32.mrf.mxu0 }
  0xdd   :  { %v203_v45 = vpack.c.bf16 %v4056_v44, %v4051_v42 }
  0xde   :  { %v4062_v47 = vpop.f32.mrf.mxu0 }
  0xdf   :  { %3330 = vmatprep.mubr.msk.bf16.mxu1 %vm223_vm1, %v203_v45 }
  0xe0   :  { %v4065_v48 = vpop.f32.mrf.mxu0  ;;  %3331 = vmatmul.mubr.msk.bf16.gmra.mxu1 %vm223_vm1, %v204_v46 }
  0xe2   :  { %v4068_v49 = vpop.f32.mrf.mxu0 }
  0xe3   :  { %v206_v52 = vpack.c.bf16 %v4068_v49, %v4062_v47 }
  0xe4   :  { %v4070_v50 = vpop.f32.mrf.mxu0 }
  0xe5   :  { %v205_v51 = vpack.c.bf16 %v4070_v50, %v4065_v48 }
  0xe7   :  { %3334 = vmatprep.mubr.msk.bf16.mxu1 %vm223_vm1, %v205_v51 }
  0xe8   :  { %3335 = vmatmul.mubr.msk.bf16.gmra.mxu1 %vm223_vm1, %v206_v52 }
 0x190   :  { %v3324_v53 = vpop.f32.mrf.mxu1 }
 0x192   :  { %v282_v54 = vpop.f32.mrf.mxu1 }
 0x193   :  { %3340 = vmatprep.mubr.msk.f32.mxu0 %vm223_vm1, %v282_v54 }
 0x194   :  { %v3325_v55 = vpop.f32.mrf.mxu1 }
 0x196   :  { %v285_v56 = vpop.f32.mrf.mxu1 }
 0x197   :  { %3341 = vmatmul.mubr.msk.f32.vlgmr.msra.gmra.mxu0 %vm223_vm1, %v285_v56 }
 0x198   :  { %v3328_v57 = vpop.f32.mrf.mxu1  ;;  %3343 = vmatprep.mubr.msk.f32.mxu0 %vm223_vm1, %v3324_v53  ;;  %3367 = vmatpush3.msra.mxu0 %v4005_v27 }
 0x19a   :  { %v298_v58 = vpop.f32.mrf.mxu1 }
 0x19b   :  { %3344 = vmatmul.mubr.msk.f32.gmra.mxu0 %vm223_vm1, %v3325_v55 }
 0x19c   :  { %v3329_v59 = vpop.f32.mrf.mxu1  ;;  %3346 = vmatprep.mubr.msk.f32.mxu0 %vm223_vm1, %v298_v58 }
 0x19e   :  { %v301_v60 = vpop.f32.mrf.mxu1 }
 0x19f   :  { %3347 = vmatmul.mubr.msk.f32.gmra.mxu0 %vm223_vm1, %v301_v60 }
 0x1a0   :  { %v3332_v61 = vpop.f32.mrf.mxu1  ;;  %3349 = vmatprep.mubr.msk.f32.mxu0 %vm223_vm1, %v3328_v57 }
 0x1a2   :  { %v314_v62 = vpop.f32.mrf.mxu1 }
 0x1a3   :  { %3350 = vmatmul.mubr.msk.f32.gmra.mxu0 %vm223_vm1, %v3329_v59  ;;  %3354 = vmatprep.mubr.msk.f32.mxu1 %vm223_vm1, %v314_v62 }
 0x1a4   :  { %v3333_v63 = vpop.f32.mrf.mxu1 }
 0x1a6   :  { %v317_v0 = vpop.f32.mrf.mxu1 }
 0x1a7   :  { %3355 = vmatmul.mubr.msk.f32.vlgmr.msra.gmra.mxu1 %vm223_vm1, %v317_v0 }
 0x1a8   :  { %v3336_v1 = vpop.f32.mrf.mxu1  ;;  %3357 = vmatprep.mubr.msk.f32.mxu1 %vm223_vm1, %v3332_v61  ;;  %3381 = vmatpush3.msra.mxu1 %v4010_v28 }
 0x1aa   :  { %v330_v2 = vpop.f32.mrf.mxu1 }
 0x1ab   :  { %3358 = vmatmul.mubr.msk.f32.gmra.mxu1 %vm223_vm1, %v3333_v63 }
 0x1ac   :  { %v3337_v3 = vpop.f32.mrf.mxu1  ;;  %3360 = vmatprep.mubr.msk.f32.mxu1 %vm223_vm1, %v330_v2 }
 0x1ae   :  { %v333_v4 = vpop.f32.mrf.mxu1 }
 0x1af   :  { %3361 = vmatmul.mubr.msk.f32.gmra.mxu1 %vm223_vm1, %v333_v4 }
 0x1b0   :  { %3363 = vmatprep.mubr.msk.f32.mxu1 %vm223_vm1, %v3336_v1 }
 0x1b3   :  { %3364 = vmatmul.mubr.msk.f32.gmra.mxu1 %vm223_vm1, %v3337_v3 }
 0x257   :  { %v3342_v5 = vpop.f32.mrf.mxu0 }
 0x258   :  { %v4098_v9 = vmul.f32 0.17677669, %v3342_v5 }
 0x259   :  { %v438_v6 = vpop.f32.mrf.mxu0 }
 0x25a   :  { %v4096_v7 = vmul.f32 0.17677669, %v438_v6  ;;  %v629_v15 = vsel %vm625_vm2, %v4098_v9, -inf }
 0x25b   :  { %v3345_v8 = vpop.f32.mrf.mxu0 }
 0x25c   :  { %v626_v10 = vsel %vm625_vm2, %v4096_v7, -inf  ;;  %v4104_v14 = vmul.f32 0.17677669, %v3345_v8 }
 0x25d   :  { %627 = vmax.xlane.f32.xlu0 %v626_v10  ;;  %v448_v11 = vpop.f32.mrf.mxu0 }
 0x25e   :  { %v4102_v12 = vmul.f32 0.17677669, %v448_v11  ;;  %v635_v21 = vsel %vm625_vm2, %v4104_v14, -inf }
 0x25f   :  { %v3348_v13 = vpop.f32.mrf.mxu0 }
 0x260   :  { %v632_v16 = vsel %vm625_vm2, %v4102_v12, -inf  ;;  %v4112_v20 = vmul.f32 0.17677669, %v3348_v13 }
 0x261   :  { %630 = vmax.xlane.f32.xlu0 %v629_v15  ;;  %633 = vmax.xlane.f32.xlu1 %v632_v16  ;;  %v458_v17 = vpop.f32.mrf.mxu0 }
 0x262   :  { %v4110_v18 = vmul.f32 0.17677669, %v458_v17  ;;  %v641_v33 = vsel %vm625_vm2, %v4112_v20, -inf }
 0x263   :  { %v3351_v19 = vpop.f32.mrf.mxu0 }
 0x264   :  { %v638_v22 = vsel %vm625_vm2, %v4110_v18, -inf  ;;  %v4120_v26 = vmul.f32 0.17677669, %v3351_v19 }
 0x265   :  { %636 = vmax.xlane.f32.xlu1 %v635_v21  ;;  %639 = vmax.xlane.f32.xlu0 %v638_v22  ;;  %v468_v23 = vpop.f32.mrf.mxu0 }
 0x266   :  { %v4118_v24 = vmul.f32 0.17677669, %v468_v23  ;;  %v647_v51 = vsel %vm625_vm2, %v4120_v26, -inf }
 0x267   :  { %v3356_v25 = vpop.f32.mrf.mxu1 }
 0x268   :  { %v644_v34 = vsel %vm625_vm2, %v4118_v24, -inf  ;;  %v4128_v46 = vmul.f32 0.17677669, %v3356_v25 }
 0x269   :  { %v570_v39 = vpop.f32.mrf.mxu1  ;;  %642 = vmax.xlane.f32.xlu1 %v641_v33  ;;  %645 = vmax.xlane.f32.xlu0 %v644_v34 }
 0x26a   :  { %v4126_v40 = vmul.f32 0.17677669, %v570_v39  ;;  %v653_v57 = vsel %vm625_vm2, %v4128_v46, -inf }
 0x26b   :  { %v3359_v45 = vpop.f32.mrf.mxu1 }
 0x26c   :  { %v650_v52 = vsel %vm625_vm2, %v4126_v40, -inf  ;;  %v4136_v56 = vmul.f32 0.17677669, %v3359_v45 }
 0x26d   :  { %v580_v53 = vpop.f32.mrf.mxu1  ;;  %648 = vmax.xlane.f32.xlu1 %v647_v51  ;;  %651 = vmax.xlane.f32.xlu0 %v650_v52 }
 0x26e   :  { %v4134_v54 = vmul.f32 0.17677669, %v580_v53  ;;  %v659_v63 = vsel %vm625_vm2, %v4136_v56, -inf }
 0x26f   :  { %v3362_v55 = vpop.f32.mrf.mxu1 }
 0x270   :  { %v656_v58 = vsel %vm625_vm2, %v4134_v54, -inf  ;;  %v4144_v62 = vmul.f32 0.17677669, %v3362_v55 }
 0x271   :  { %v590_v59 = vpop.f32.mrf.mxu1  ;;  %654 = vmax.xlane.f32.xlu1 %v653_v57  ;;  %657 = vmax.xlane.f32.xlu0 %v656_v58 }
 0x272   :  { %v4142_v60 = vmul.f32 0.17677669, %v590_v59  ;;  %v665_v4 = vsel %vm625_vm2, %v4144_v62, -inf }
 0x273   :  { %v3365_v61 = vpop.f32.mrf.mxu1 }
 0x274   :  { %v662_v0 = vsel %vm625_vm2, %v4142_v60, -inf  ;;  %v4152_v3 = vmul.f32 0.17677669, %v3365_v61 }
 0x275   :  { %v600_v1 = vpop.f32.mrf.mxu1  ;;  %660 = vmax.xlane.f32.xlu1 %v659_v63  ;;  %663 = vmax.xlane.f32.xlu0 %v662_v0 }
 0x276   :  { %v4150_v2 = vmul.f32 0.17677669, %v600_v1  ;;  %v671_v6 = vsel %vm625_vm2, %v4152_v3, -inf }
 0x278   :  { %v668_v5 = vsel %vm625_vm2, %v4150_v2, -inf }
 0x279   :  { %666 = vmax.xlane.f32.xlu1 %v665_v4  ;;  %669 = vmax.xlane.f32.xlu0 %v668_v5 }
 0x27d   :  { %672 = vmax.xlane.f32.xlu1 %v671_v6 }
 0x2e6   :  { %v628_v8 = vpop.xlane.xlu0 %627 }
 0x2e7   :  { %v674_v10 = vsub.f32 %v4096_v7, %v628_v8 }
 0x2e9   :  { %v690_v11 = vmul.f32 1.442695, %v674_v10 }
 0x2ea   :  { %v631_v13 = vpop.xlane.xlu0 %630  ;;  %v634_v15 = vpop.xlane.xlu1 %633 }
 0x2eb   :  { %3700 = vpow2.f32 %v690_v11  ;;  %v675_v16 = vsub.f32 %v4098_v9, %v631_v13  ;;  %v676_v17 = vsub.f32 %v4102_v12, %v634_v15 }
 0x2ed   :  { %v692_v19 = vmul.f32 1.442695, %v675_v16  ;;  %v694_v21 = vmul.f32 1.442695, %v676_v17 }
 0x2ee   :  { %v637_v22 = vpop.xlane.xlu1 %636  ;;  %v640_v23 = vpop.xlane.xlu0 %639 }
 0x2ef   :  { %3702 = vpow2.f32 %v692_v19  ;;  %v677_v25 = vsub.f32 %v4104_v14, %v637_v22  ;;  %v678_v33 = vsub.f32 %v4110_v18, %v640_v23 }
 0x2f0   :  { %3704 = vpow2.f32 %v694_v21 }
 0x2f1   :  { %v696_v34 = vmul.f32 1.442695, %v677_v25  ;;  %v698_v7 = vmul.f32 1.442695, %v678_v33 }
 0x2f2   :  { %v643_v39 = vpop.xlane.xlu1 %642  ;;  %v646_v45 = vpop.xlane.xlu0 %645 }
 0x2f3   :  { %3706 = vpow2.f32 %v696_v34  ;;  %v679_v51 = vsub.f32 %v4112_v20, %v643_v39  ;;  %v680_v9 = vsub.f32 %v4118_v24, %v646_v45 }
 0x2f4   :  { %3708 = vpow2.f32 %v698_v7 }
 0x2f5   :  { %v700_v12 = vmul.f32 1.442695, %v679_v51  ;;  %v702_v52 = vmul.f32 1.442695, %v680_v9 }
 0x2f6   :  { %v649_v53 = vpop.xlane.xlu1 %648  ;;  %v652_v55 = vpop.xlane.xlu0 %651 }
 0x2f7   :  { %3710 = vpow2.f32 %v700_v12  ;;  %v681_v14 = vsub.f32 %v4120_v26, %v649_v53  ;;  %v682_v18 = vsub.f32 %v4126_v40, %v652_v55 }
 0x2f8   :  { %v4169_v57 = vpop.eup %3700  ;;  %3712 = vpow2.f32 %v702_v52 }
 0x2f9   :  { %v704_v58 = vmul.f32 1.442695, %v681_v14  ;;  %v706_v59 = vmul.f32 1.442695, %v682_v18  ;;  %v722_v20 = vsel %vm625_vm2, %v4169_v57, 0.0 }
 0x2fa   :  { %v655_v61 = vpop.xlane.xlu1 %654  ;;  %723 = vadd.xlane.f32.xlu0 %v722_v20  ;;  %v658_v24 = vpop.xlane.xlu0 %657 }
 0x2fb   :  { %3714 = vpow2.f32 %v704_v58  ;;  %v683_v63 = vsub.f32 %v4128_v46, %v655_v61  ;;  %v684_v0 = vsub.f32 %v4134_v54, %v658_v24 }
 0x2fc   :  { %v4175_v1 = vpop.eup %3702  ;;  %3716 = vpow2.f32 %v706_v59 }
 0x2fd   :  { %v4177_v26 = vpop.eup %3704  ;;  %v708_v40 = vmul.f32 1.442695, %v683_v63  ;;  %v710_v4 = vmul.f32 1.442695, %v684_v0  ;;  %v725_v5 = vsel %vm625_vm2, %v4175_v1, 0.0 }
 0x2fe   :  { %726 = vadd.xlane.f32.xlu1 %v725_v5  ;;  %v661_v6 = vpop.xlane.xlu1 %660  ;;  %v728_v8 = vsel %vm625_vm2, %v4177_v26, 0.0  ;;  %v664_v10 = vpop.xlane.xlu0 %663  ;;  %v3693_v5 = vld [vmem:[%s4901_s4 + $0x8] sm:$0xff]  }
 0x2ff   :  { %3718 = vpow2.f32 %v708_v40  ;;  %v685_v46 = vsub.f32 %v4136_v56, %v661_v6  ;;  %729 = vadd.xlane.f32.xlu0 %v728_v8  ;;  %v686_v54 = vsub.f32 %v4142_v60, %v664_v10  ;;  %3394 = vmatprep.subr.bf16.mxu0 %v3693_v5 }
 0x300   :  { %v4185_v11 = vpop.eup %3706  ;;  %3720 = vpow2.f32 %v710_v4 }
 0x301   :  { %v4187_v13 = vpop.eup %3708  ;;  %v712_v15 = vmul.f32 1.442695, %v685_v46  ;;  %v714_v16 = vmul.f32 1.442695, %v686_v54  ;;  %v731_v17 = vsel %vm625_vm2, %v4185_v11, 0.0 }
 0x302   :  { %732 = vadd.xlane.f32.xlu1 %v731_v17  ;;  %v667_v19 = vpop.xlane.xlu1 %666  ;;  %v734_v21 = vsel %vm625_vm2, %v4187_v13, 0.0  ;;  %v670_v22 = vpop.xlane.xlu0 %669 }
 0x303   :  { %3722 = vpow2.f32 %v712_v15  ;;  %v687_v56 = vsub.f32 %v4144_v62, %v667_v19  ;;  %735 = vadd.xlane.f32.xlu0 %v734_v21  ;;  %v688_v60 = vsub.f32 %v4150_v2, %v670_v22 }
 0x304   :  { %v4195_v23 = vpop.eup %3710  ;;  %3724 = vpow2.f32 %v714_v16 }
 0x305   :  { %v4197_v25 = vpop.eup %3712  ;;  %v716_v33 = vmul.f32 1.442695, %v687_v56  ;;  %v718_v34 = vmul.f32 1.442695, %v688_v60  ;;  %v737_v7 = vsel %vm625_vm2, %v4195_v23, 0.0 }
 0x306   :  { %738 = vadd.xlane.f32.xlu1 %v737_v7  ;;  %v673_v39 = vpop.xlane.xlu1 %672  ;;  %v740_v45 = vsel %vm625_vm2, %v4197_v25, 0.0 }
 0x307   :  { %3726 = vpow2.f32 %v716_v33  ;;  %v689_v62 = vsub.f32 %v4152_v3, %v673_v39  ;;  %741 = vadd.xlane.f32.xlu0 %v740_v45 }
 0x308   :  { %v4204_v2 = vpop.eup %3714  ;;  %3728 = vpow2.f32 %v718_v34 }
 0x309   :  { %v4206_v51 = vpop.eup %3716  ;;  %v720_v9 = vmul.f32 1.442695, %v689_v62  ;;  %v743_v12 = vsel %vm625_vm2, %v4204_v2, 0.0 }
 0x30a   :  { %744 = vadd.xlane.f32.xlu1 %v743_v12  ;;  %v746_v52 = vsel %vm625_vm2, %v4206_v51, 0.0 }
 0x30b   :  { %3730 = vpow2.f32 %v720_v9  ;;  %747 = vadd.xlane.f32.xlu0 %v746_v52 }
 0x30c   :  { %v4212_v53 = vpop.eup %3718 }
 0x30d   :  { %v4214_v55 = vpop.eup %3720  ;;  %v749_v3 = vsel %vm625_vm2, %v4212_v53, 0.0 }
 0x30e   :  { %750 = vadd.xlane.f32.xlu1 %v749_v3  ;;  %v752_v14 = vsel %vm625_vm2, %v4214_v55, 0.0 }
 0x30f   :  { %753 = vadd.xlane.f32.xlu0 %v752_v14 }
 0x310   :  { %v4220_v18 = vpop.eup %3722 }
 0x311   :  { %v4222_v58 = vpop.eup %3724  ;;  %v755_v59 = vsel %vm625_vm2, %v4220_v18, 0.0 }
 0x312   :  { %756 = vadd.xlane.f32.xlu1 %v755_v59  ;;  %v758_v20 = vsel %vm625_vm2, %v4222_v58, 0.0 }
 0x313   :  { %759 = vadd.xlane.f32.xlu0 %v758_v20 }
 0x314   :  { %v4228_v61 = vpop.eup %3726 }
 0x315   :  { %v4230_v24 = vpop.eup %3728  ;;  %v761_v63 = vsel %vm625_vm2, %v4228_v61, 0.0 }
 0x316   :  { %762 = vadd.xlane.f32.xlu1 %v761_v63  ;;  %v764_v0 = vsel %vm625_vm2, %v4230_v24, 0.0 }
 0x317   :  { %765 = vadd.xlane.f32.xlu0 %v764_v0 }
 0x318   :  { %v4236_v40 = vpop.eup %3730 }
 0x319   :  { %v767_v4 = vsel %vm625_vm2, %v4236_v40, 0.0 }
 0x31a   :  { %768 = vadd.xlane.f32.xlu1 %v767_v4 }
 0x383   :  { %v724_v6 = vpop.xlane.xlu0 %723 }
 0x384   :  { %3732 = vrcp.f32 %v724_v6 }
 0x387   :  { %v727_v8 = vpop.xlane.xlu1 %726 }
 0x388   :  { %3734 = vrcp.f32 %v727_v8  ;;  %v730_v10 = vpop.xlane.xlu0 %729 }
 0x389   :  { %3736 = vrcp.f32 %v730_v10 }
 0x38b   :  { %v733_v46 = vpop.xlane.xlu1 %732 }
 0x38c   :  { %3738 = vrcp.f32 %v733_v46  ;;  %v736_v54 = vpop.xlane.xlu0 %735 }
 0x38d   :  { %3740 = vrcp.f32 %v736_v54 }
 0x38f   :  { %v739_v15 = vpop.xlane.xlu1 %738 }
 0x390   :  { %3742 = vrcp.f32 %v739_v15  ;;  %v742_v16 = vpop.xlane.xlu0 %741 }
 0x391   :  { %v3733_v17 = vpop.eup %3732  ;;  %3744 = vrcp.f32 %v742_v16 }
 0x392   :  { %v786_v19 = vmul.f32 %v3733_v17, %v4169_v57 }
 0x393   :  { %v745_v21 = vpop.xlane.xlu1 %744 }
 0x394   :  { %3746 = vrcp.f32 %v745_v21  ;;  %v748_v22 = vpop.xlane.xlu0 %747  ;;  %3368 = vmatprep.mubr.msk.f32.mxu0 %vm625_vm2, %v786_v19 }
 0x395   :  { %v3735_v56 = vpop.eup %3734  ;;  %3748 = vrcp.f32 %v748_v22 }
 0x396   :  { %v3737_v60 = vpop.eup %3736  ;;  %v787_v33 = vmul.f32 %v3735_v56, %v4175_v1 }
 0x397   :  { %v751_v34 = vpop.xlane.xlu1 %750  ;;  %v788_v7 = vmul.f32 %v3737_v60, %v4177_v26 }
 0x398   :  { %3750 = vrcp.f32 %v751_v34  ;;  %v754_v39 = vpop.xlane.xlu0 %753  ;;  %3369 = vmatmul.mubr.msk.f32.vlgmr.msra.gmra.mxu0 %vm625_vm2, %v787_v33 }
 0x399   :  { %v3739_v45 = vpop.eup %3738  ;;  %3752 = vrcp.f32 %v754_v39  ;;  %3371 = vmatprep.mubr.msk.f32.mxu0 %vm625_vm2, %v788_v7  ;;  %3395 = vmatpush3.bf16.msra.mxu0 %v3693_v5 }
 0x39a   :  { %v3741_v57 = vpop.eup %3740  ;;  %v789_v62 = vmul.f32 %v3739_v45, %v4185_v11 }
 0x39b   :  { %v757_v9 = vpop.xlane.xlu1 %756  ;;  %v790_v12 = vmul.f32 %v3741_v57, %v4187_v13 }
 0x39c   :  { %3754 = vrcp.f32 %v757_v9  ;;  %v760_v1 = vpop.xlane.xlu0 %759  ;;  %3372 = vmatmul.mubr.msk.f32.gmra.mxu0 %vm625_vm2, %v789_v62 }
 0x39d   :  { %v3743_v26 = vpop.eup %3742  ;;  %3756 = vrcp.f32 %v760_v1  ;;  %3374 = vmatprep.mubr.msk.f32.mxu0 %vm625_vm2, %v790_v12 }
 0x39e   :  { %v3745_v52 = vpop.eup %3744  ;;  %v791_v3 = vmul.f32 %v3743_v26, %v4195_v23 }
 0x39f   :  { %v763_v14 = vpop.xlane.xlu1 %762  ;;  %v792_v59 = vmul.f32 %v3745_v52, %v4197_v25 }
 0x3a0   :  { %3758 = vrcp.f32 %v763_v14  ;;  %v766_v20 = vpop.xlane.xlu0 %765  ;;  %3375 = vmatmul.mubr.msk.f32.gmra.mxu0 %vm625_vm2, %v791_v3  ;;  %v1306_v14 = vld [vmem:[%s4903_s6] sm:$0xff] }
 0x3a1   :  { %v3747_v11 = vpop.eup %3746  ;;  %3760 = vrcp.f32 %v766_v20  ;;  %3377 = vmatprep.mubr.msk.f32.mxu0 %vm625_vm2, %v792_v59  ;;  %v1307_v59 = vld [vmem:[%s4903_s6 + $0x8] sm:$0xff] }
 0x3a2   :  { %v3749_v13 = vpop.eup %3748  ;;  %v793_v63 = vmul.f32 %v3747_v11, %v4204_v2 }
 0x3a3   :  { %v769_v0 = vpop.xlane.xlu1 %768  ;;  %v794_v4 = vmul.f32 %v3749_v13, %v4206_v51  ;;  %v1322_v13 = vpack.c.bf16 %v1307_v59, %v1306_v14 }
 0x3a4   :  { %3762 = vrcp.f32 %v769_v0  ;;  %3378 = vmatmul.mubr.msk.f32.gmra.mxu0 %vm625_vm2, %v793_v63  ;;  %v1308_v0 = vld [vmem:[%s4903_s6 + $0x10] sm:$0xff] }
 0x3a5   :  { %v3751_v23 = vpop.eup %3750  ;;  %3382 = vmatprep.mubr.msk.f32.mxu1 %vm625_vm2, %v794_v4  ;;  %v1309_v4 = vld [vmem:[%s4903_s6 + $0x18] sm:$0xff] }
 0x3a6   :  { %v3753_v25 = vpop.eup %3752  ;;  %v795_v5 = vmul.f32 %v3751_v23, %v4212_v53  ;;  %v1310_v23 = vld [vmem:[%s4903_s6 + $0x20] sm:$0xff] }
 0x3a7   :  { %v796_v6 = vmul.f32 %v3753_v25, %v4214_v55  ;;  %v1311_v25 = vld [vmem:[%s4903_s6 + $0x28] sm:$0xff] }
 0x3a8   :  { %3383 = vmatmul.mubr.msk.f32.vlgmr.msra.gmra.mxu1 %vm625_vm2, %v795_v5  ;;  %v1323_v5 = vpack.c.bf16 %v1309_v4, %v1308_v0 }
 0x3a9   :  { %v3755_v8 = vpop.eup %3754  ;;  %3385 = vmatprep.mubr.msk.f32.mxu1 %vm625_vm2, %v796_v6  ;;  %v1324_v6 = vpack.c.bf16 %v1311_v25, %v1310_v23 }
 0x3aa   :  { %v3757_v2 = vpop.eup %3756  ;;  %v797_v10 = vmul.f32 %v3755_v8, %v4220_v18  ;;  %v3694_v18 = vld [vmem:[%s4901_s4] sm:$0xff]   ;;  %v1312_v8 = vld [vmem:[%s4903_s6 + $0x30] sm:$0xff] }
 0x3ab   :  { %v798_v51 = vmul.f32 %v3757_v2, %v4222_v58  ;;  %3396 = vmatprep.subr.bf16.mxu0 %v3694_v18  ;;  %v1330_v58 = vld [vmem:[%s4904_s7] sm:$0xf]  ;;  %v1313_v2 = vld [vmem:[%s4903_s6 + $0x38] sm:$0xff] }
 0x3ac   :  { %3386 = vmatmul.mubr.msk.f32.gmra.mxu1 %vm625_vm2, %v797_v10  ;;  %3397 = vmatpush3.bf16.msra.mxu0 %v3694_v18  ;;  %v1314_v10 = vld [vmem:[%s4903_s6 + $0x40] sm:$0xff]  ;;  %v1320_v18 = vld [vmem:[%s4903_s6 + $0x70] sm:$0xff] }
 0x3ad   :  { %v3759_v46 = vpop.eup %3758  ;;  %3388 = vmatprep.mubr.msk.f32.mxu1 %vm625_vm2, %v798_v51  ;;  %3684 = vmatprep.subr.msk.bf16.mxu0 %vm1355_vm3, %v1330_v58  ;;  %v1315_v51 = vld [vmem:[%s4903_s6 + $0x48] sm:$0xff] }
 0x3ae   :  { %v3761_v54 = vpop.eup %3760  ;;  %v799_v53 = vmul.f32 %v3759_v46, %v4228_v61  ;;  %v1357_v61 = vsel %vm1355_vm3, %v1330_v58, 0  ;;  %v1325_v46 = vpack.c.bf16 %v1313_v2, %v1312_v8  ;;  %v1321_v58 = vld [vmem:[%s4903_s6 + $0x78] sm:$0xff] }
 0x3af   :  { %v800_v55 = vmul.f32 %v3761_v54, %v4230_v24  ;;  %v1326_v54 = vpack.c.bf16 %v1315_v51, %v1314_v10  ;;  %v3695_v51 = vld [vmem:[%s4902_s5] sm:$0xff]  }
 0x3b0   :  { %3389 = vmatmul.mubr.msk.f32.gmra.mxu1 %vm625_vm2, %v799_v53  ;;  %v1317_v53 = vld [vmem:[%s4903_s6 + $0x58] sm:$0xff] }
 0x3b1   :  { %v3763_v15 = vpop.eup %3762  ;;  %3391 = vmatprep.mubr.msk.f32.mxu1 %vm625_vm2, %v800_v55  ;;  %v1318_v55 = vld [vmem:[%s4903_s6 + $0x60] sm:$0xff] }
 0x3b2   :  { %v801_v16 = vmul.f32 %v3763_v15, %v4236_v40 }
 0x3b4   :  { %3392 = vmatmul.mubr.msk.f32.gmra.mxu1 %vm625_vm2, %v801_v16 }
 0x458   :  { %v3370_v24 = vpop.f32.mrf.mxu0 }
 0x45a   :  { %v892_v17 = vpop.f32.mrf.mxu0 }
 0x45b   :  { %v1060_v19 = vpack.c.bf16 %v3370_v24, %v892_v17  ;;  %v3862_v24 = vmov 0.0  }
 0x45c   :  { %v3373_v21 = vpop.f32.mrf.mxu0  ;;  %3414 = vmatprep.subr.bf16.mxu1 %v3862_v24  ;;  %3430 = vmatprep.mubr.msk.bf16.mxu1 %vm3863_vm4, %v3862_v24 }
 0x45d   :  { %3398 = vmatprep.mubr.msk.bf16.mxu0 %vm223_vm1, %v1060_v19 }
 0x45e   :  { %v902_v40 = vpop.f32.mrf.mxu0 }
 0x45f   :  { %v1061_v22 = vpack.c.bf16 %v3373_v21, %v902_v40 }
 0x460   :  { %v3376_v56 = vpop.f32.mrf.mxu0 }
 0x461   :  { %3399 = vmatmul.mubr.msk.bf16.vlgmr.msra.gmra.mxu0 %vm223_vm1, %v1061_v22 }
 0x462   :  { %v912_v60 = vpop.f32.mrf.mxu0  ;;  %3435 = vmatpush3.bf16.msra.mxu0 %v1357_v61  ;;  %v1329_v61 = vpack.c.bf16 %v1321_v58, %v1320_v18 }
 0x463   :  { %v1062_v33 = vpack.c.bf16 %v3376_v56, %v912_v60  ;;  %3492 = vmatprep.subr.msk.mxu0 %vm223_vm1, %v4005_v27 }
 0x464   :  { %v3379_v34 = vpop.f32.mrf.mxu0 }
 0x465   :  { %3402 = vmatprep.mubr.msk.bf16.mxu0 %vm223_vm1, %v1062_v33 }
 0x466   :  { %v922_v7 = vpop.f32.mrf.mxu0 }
 0x467   :  { %v1063_v39 = vpack.c.bf16 %v3379_v34, %v922_v7 }
 0x468   :  { %v3384_v45 = vpop.f32.mrf.mxu1 }
 0x469   :  { %3403 = vmatmul.mubr.msk.bf16.gmra.mxu0 %vm223_vm1, %v1063_v39 }
 0x46a   :  { %v1021_v57 = vpop.f32.mrf.mxu1 }
 0x46b   :  { %v1064_v62 = vpack.c.bf16 %v3384_v45, %v1021_v57 }
 0x46c   :  { %v3387_v9 = vpop.f32.mrf.mxu1 }
 0x46d   :  { %3406 = vmatprep.mubr.msk.bf16.mxu0 %vm223_vm1, %v1064_v62 }
 0x46e   :  { %v1031_v12 = vpop.f32.mrf.mxu1 }
 0x46f   :  { %v1065_v1 = vpack.c.bf16 %v3387_v9, %v1031_v12 }
 0x470   :  { %v3390_v26 = vpop.f32.mrf.mxu1 }
 0x471   :  { %3407 = vmatmul.mubr.msk.bf16.gmra.mxu0 %vm223_vm1, %v1065_v1 }
 0x472   :  { %v1041_v52 = vpop.f32.mrf.mxu1 }
 0x473   :  { %v1066_v3 = vpack.c.bf16 %v3390_v26, %v1041_v52 }
 0x474   :  { %v3393_v20 = vpop.f32.mrf.mxu1 }
 0x475   :  { %3410 = vmatprep.mubr.msk.bf16.mxu0 %vm223_vm1, %v1066_v3 }
 0x476   :  { %v1051_v11 = vpop.f32.mrf.mxu1 }
 0x477   :  { %v1067_v63 = vpack.c.bf16 %v3393_v20, %v1051_v11 }
 0x479   :  { %3411 = vmatmul.mubr.msk.bf16.gmra.mxu0 %vm223_vm1, %v1067_v63 }
 0x47a   :  { %3436 = vmatprep.mubr.msk.bf16.mxu0 %vm625_vm2, %v1322_v13 }
 0x481   :  { %3437 = vmatmul.mubr.msk.bf16.vlgmr.msra.gmra.mxu0 %vm625_vm2, %v1323_v5 }
 0x482   :  { %3440 = vmatprep.mubr.msk.bf16.mxu0 %vm625_vm2, %v1324_v6  ;;  %3493 = vmatpush3.xpose.msk.msra.mxu0 %vm223_vm1, %v4005_v27  ;;  %v1316_v27 = vld [vmem:[%s4903_s6 + $0x50] sm:$0xff] }
 0x483   :  { %3506 = vmatprep.subr.msk.mxu0 %vm223_vm1, %v4010_v28  ;;  %v1319_v28 = vld [vmem:[%s4903_s6 + $0x68] sm:$0xff]  ;;  %v1327_v15 = vpack.c.bf16 %v1317_v53, %v1316_v27  ;;  %v3697_v53 = vld [vmem:[%s4905_s8] sm:$0xff]  }
 0x484   :  { %v1328_v16 = vpack.c.bf16 %v1319_v28, %v1318_v55 }
 0x489   :  { %3441 = vmatmul.mubr.msk.bf16.gmra.mxu0 %vm625_vm2, %v1325_v46 }
 0x48a   :  { %3444 = vmatprep.mubr.msk.bf16.mxu0 %vm625_vm2, %v1326_v54  ;;  %v3696_v54 = vld [vmem:[%s4905_s8 + $0x8] sm:$0xff]  }
 0x491   :  { %3445 = vmatmul.mubr.msk.bf16.gmra.mxu0 %vm625_vm2, %v1327_v15 }
 0x492   :  { %3448 = vmatprep.mubr.msk.bf16.mxu0 %vm625_vm2, %v1328_v16 }
 0x499   :  { %3449 = vmatmul.mubr.msk.bf16.gmra.mxu0 %vm625_vm2, %v1329_v61 }
 0x521   :  { %v3400_v17 = vpop.f32.mrf.mxu0 }
 0x522   :  { %v1207_v40 = vadd.f32 %v3400_v17, %v4019_v29 }
 0x523   :  { %v1142_v19 = vpop.f32.mrf.mxu0 }
 0x524   :  { %v1205_v60 = vadd.f32 %v1142_v19, %v4021_v30 }
 0x525   :  { %v3401_v21 = vpop.f32.mrf.mxu0 }
 0x526   :  { %v1208_v22 = vadd.f32 %v3401_v21, %v4023_v31 }
 0x527   :  { %v1145_v56 = vpop.f32.mrf.mxu0 }
 0x528   :  { %v1224_v33 = vpack.c.bf16 %v1208_v22, %v1207_v40  ;;  %v1206_v34 = vadd.f32 %v1145_v56, %v4025_v32 }
 0x529   :  { %v3404_v7 = vpop.f32.mrf.mxu0 }
 0x52a   :  { %v1223_v39 = vpack.c.bf16 %v1206_v34, %v1205_v60 }
 0x52b   :  { %v1158_v45 = vpop.f32.mrf.mxu0 }
 0x52c   :  { %v1240_v10 = vsel %vm223_vm1, %v1223_v39, 0 }
 0x52d   :  { %v3405_v57 = vpop.f32.mrf.mxu0 }
 0x52f   :  { %v1161_v62 = vpop.f32.mrf.mxu0 }
 0x531   :  { %v3408_v9 = vpop.f32.mrf.mxu0 }
 0x533   :  { %v1174_v12 = vpop.f32.mrf.mxu0 }
 0x535   :  { %v3409_v1 = vpop.f32.mrf.mxu0 }
 0x536   :  { %v1216_v63 = vadd.f32 %v3409_v1, %v4054_v43  ;;  %v1212_v43 = vadd.f32 %v3405_v57, %v4039_v37  ;;  %v3836_v57 = vld [vmem:[%s4897_s0] sm:$0xff] }
 0x537   :  { %v1177_v26 = vpop.f32.mrf.mxu0 }
 0x539   :  { %v3412_v52 = vpop.f32.mrf.mxu0 }
 0x53a   :  { %v1219_v31 = vadd.f32 %v3412_v52, %v4062_v47  ;;  %v1215_v47 = vadd.f32 %v3408_v9, %v4048_v41  ;;  %v1211_v41 = vadd.f32 %v3404_v7, %v4031_v35  ;;  %v1243_v35 = vsel %vm223_vm1, %v1224_v33, 0 }
 0x53b   :  { %v1190_v3 = vpop.f32.mrf.mxu0 }
 0x53c   :  { %v1217_v11 = vadd.f32 %v1190_v3, %v4065_v48  ;;  %v1213_v48 = vadd.f32 %v1174_v12, %v4051_v42  ;;  %v1226_v5 = vpack.c.bf16 %v1212_v43, %v1211_v41  ;;  %v1209_v42 = vadd.f32 %v1158_v45, %v4034_v36 }
 0x53d   :  { %v3413_v29 = vpop.f32.mrf.mxu0 }
 0x53e   :  { %v1220_v14 = vadd.f32 %v3413_v29, %v4068_v49  ;;  %v1228_v49 = vpack.c.bf16 %v1216_v63, %v1215_v47  ;;  %v1249_v6 = vsel %vm223_vm1, %v1226_v5, 0 }
 0x53f   :  { %v1193_v30 = vpop.f32.mrf.mxu0 }
 0x540   :  { %v1230_v59 = vpack.c.bf16 %v1220_v14, %v1219_v31  ;;  %v1218_v32 = vadd.f32 %v1193_v30, %v4070_v50  ;;  %v1214_v50 = vadd.f32 %v1177_v26, %v4056_v44  ;;  %v1255_v4 = vsel %vm223_vm1, %v1228_v49, 0 }
 0x541   :  { %v1210_v44 = vadd.f32 %v1161_v62, %v4042_v38  ;;  %v4383_v2 = vpop.f32.mrf.mxu0  ;;  %v4502_v62 = vld [vmem:[%s4897_s0 + $0x8] sm:$0xff] }
 0x542   :  { %v1261_v20 = vsel %vm223_vm1, %v1230_v59, 0  ;;  %v1229_v13 = vpack.c.bf16 %v1218_v32, %v1217_v11  ;;  %v1227_v23 = vpack.c.bf16 %v1214_v50, %v1213_v48  ;;  %v1464_v9 = vpack.c.bf16 %v4502_v62, %v3836_v57 }
 0x543   :  { %3415 = vmatpush3.bf16.xpose.msra.mxu1 %v1261_v20  ;;  %v1225_v8 = vpack.c.bf16 %v1210_v44, %v1209_v42  ;;  %v4386_v38 = vpop.f32.mrf.mxu0 }
 0x544   :  { %3416 = vmatprep.subr.bf16.mxu1 %v3862_v24  ;;  %v1258_v0 = vsel %vm223_vm1, %v1229_v13, 0  ;;  %v1252_v25 = vsel %vm223_vm1, %v1227_v23, 0 }
 0x545   :  { %v1246_v37 = vsel %vm223_vm1, %v1225_v8, 0  ;;  %v4389_v36 = vpop.f32.mrf.mxu0 }
 0x546   :  { %v1457_v16 = vpack.c.bf16 %v4389_v36, %v4383_v2 }
 0x547   :  { %v4395_v46 = vpop.f32.mrf.mxu0 }
 0x548   :  { %v1456_v28 = vpack.c.bf16 %v4395_v46, %v4386_v38 }
 0x549   :  { %v4400_v27 = vpop.f32.mrf.mxu0 }
 0x54b   :  { %3417 = vmatpush3.bf16.xpose.msra.mxu1 %v1258_v0  ;;  %v4409_v55 = vpop.f32.mrf.mxu0 }
 0x54c   :  { %3418 = vmatprep.subr.bf16.mxu1 %v3862_v24 }
 0x54d   :  { %v4413_v15 = vpop.f32.mrf.mxu0 }
 0x54e   :  { %v1459_v19 = vpack.c.bf16 %v4413_v15, %v4400_v27 }
 0x54f   :  { %v4426_v18 = vpop.f32.mrf.mxu0 }
 0x550   :  { %v1458_v58 = vpack.c.bf16 %v4426_v18, %v4409_v55 }
 0x551   :  { %v4440_v61 = vpop.f32.mrf.mxu0 }
 0x553   :  { %3419 = vmatpush3.bf16.xpose.msra.mxu1 %v1255_v4  ;;  %v4448_v17 = vpop.f32.mrf.mxu0 }
 0x554   :  { %3420 = vmatprep.subr.bf16.mxu1 %v3862_v24 }
 0x555   :  { %v4455_v21 = vpop.f32.mrf.mxu0 }
 0x556   :  { %v1461_v33 = vpack.c.bf16 %v4455_v21, %v4440_v61 }
 0x557   :  { %v4463_v40 = vpop.f32.mrf.mxu0 }
 0x558   :  { %v1460_v22 = vpack.c.bf16 %v4463_v40, %v4448_v17 }
 0x559   :  { %v4470_v56 = vpop.f32.mrf.mxu0 }
 0x55b   :  { %3421 = vmatpush3.bf16.xpose.msra.mxu1 %v1252_v25  ;;  %v4475_v60 = vpop.f32.mrf.mxu0 }
 0x55c   :  { %3422 = vmatprep.subr.bf16.mxu1 %v3862_v24 }
 0x55d   :  { %v4479_v34 = vpop.f32.mrf.mxu0 }
 0x55e   :  { %v1463_v45 = vpack.c.bf16 %v4479_v34, %v4470_v56 }
 0x55f   :  { %v4484_v7 = vpop.f32.mrf.mxu0 }
 0x560   :  { %v1462_v39 = vpack.c.bf16 %v4484_v7, %v4475_v60 }
 0x563   :  { %3423 = vmatpush3.bf16.xpose.msra.mxu1 %v1249_v6 }
 0x564   :  { %3424 = vmatprep.subr.bf16.mxu1 %v3862_v24 }
 0x56b   :  { %3425 = vmatpush3.bf16.xpose.msra.mxu1 %v1246_v37 }
 0x56c   :  { %3426 = vmatprep.subr.bf16.mxu1 %v3862_v24 }
 0x573   :  { %3427 = vmatpush3.bf16.xpose.msra.mxu1 %v1243_v35 }
 0x574   :  { %3428 = vmatprep.subr.bf16.mxu1 %v3862_v24 }
 0x57b   :  { %3429 = vmatpush3.bf16.xpose.msra.mxu1 %v1240_v10 }
 0x57c   :  { %3452 = vmatprep.subr.bf16.mxu1 %v3862_v24 }
 0x582   :  { %3431 = vmatmul.mubr.msk.bf16.vlgmr.msra.gmra.mxu1 %vm223_vm1, %v3695_v51 }
 0x583   :  { %3453 = vmatpush3.bf16.msra.mxu1 %v3696_v54  ;;  %3456 = vmatprep.mubr.msk.bf16.mxu1 %vm3863_vm4, %v3862_v24 }
 0x584   :  { %3454 = vmatprep.subr.bf16.mxu1 %v3862_v24 }
 0x587   :  { %3455 = vmatpush3.bf16.msra.mxu1 %v3697_v53 }
 0x588   :  { %3548 = vmatprep.subr.mxu1 %v3862_v24 }
 0x58a   :  { %3457 = vmatmul.mubr.msk.bf16.vlgmr.msra.gmra.mxu1 %vm223_vm1, %v1456_v28 }
 0x58b   :  { %3549 = vmatpush3.xpose.msk.msra.mxu1 %vm223_vm1, %v4413_v15  ;;  %3460 = vmatprep.mubr.msk.bf16.mxu1 %vm3863_vm4, %v3862_v24 }
 0x58c   :  { %3550 = vmatprep.subr.mxu1 %v3862_v24 }
 0x58f   :  { %3551 = vmatpush3.xpose.msk.msra.mxu1 %vm223_vm1, %v4400_v27 }
 0x590   :  { %3552 = vmatprep.subr.mxu1 %v3862_v24 }
 0x592   :  { %3461 = vmatmul.mubr.msk.bf16.gmra.mxu1 %vm223_vm1, %v1457_v16 }
 0x593   :  { %3553 = vmatpush3.xpose.msk.msra.mxu1 %vm223_vm1, %v4426_v18  ;;  %3464 = vmatprep.mubr.msk.bf16.mxu1 %vm3863_vm4, %v3862_v24 }
 0x594   :  { %3554 = vmatprep.subr.mxu1 %v3862_v24 }
 0x597   :  { %3555 = vmatpush3.xpose.msk.msra.mxu1 %vm223_vm1, %v4409_v55 }
 0x598   :  { %3556 = vmatprep.subr.mxu1 %v3862_v24 }
 0x59a   :  { %3465 = vmatmul.mubr.msk.bf16.gmra.mxu1 %vm223_vm1, %v1458_v58 }
 0x59b   :  { %3557 = vmatpush3.xpose.msk.msra.mxu1 %vm223_vm1, %v4389_v36  ;;  %3468 = vmatprep.mubr.msk.bf16.mxu1 %vm3863_vm4, %v3862_v24 }
 0x59c   :  { %3558 = vmatprep.subr.mxu1 %v3862_v24 }
 0x59f   :  { %3559 = vmatpush3.xpose.msk.msra.mxu1 %vm223_vm1, %v4383_v2 }
 0x5a0   :  { %3560 = vmatprep.subr.mxu1 %v3862_v24 }
 0x5a2   :  { %3469 = vmatmul.mubr.msk.bf16.gmra.mxu1 %vm223_vm1, %v1459_v19 }
 0x5a3   :  { %3561 = vmatpush3.xpose.msk.msra.mxu1 %vm223_vm1, %v4395_v46  ;;  %3472 = vmatprep.mubr.msk.bf16.mxu1 %vm3863_vm4, %v3862_v24 }
 0x5a4   :  { %3562 = vmatprep.subr.mxu1 %v3862_v24 }
 0x5a7   :  { %3563 = vmatpush3.xpose.msk.msra.mxu1 %vm223_vm1, %v4386_v38 }
 0x5a8   :  { %3586 = vmatprep.subr.mxu1 %v3862_v24 }
 0x5aa   :  { %3473 = vmatmul.mubr.msk.bf16.gmra.mxu1 %vm223_vm1, %v1460_v22 }
 0x5ab   :  { %3476 = vmatprep.mubr.msk.bf16.mxu1 %vm3863_vm4, %v3862_v24 }
 0x5b2   :  { %3477 = vmatmul.mubr.msk.bf16.gmra.mxu1 %vm223_vm1, %v1461_v33 }
 0x5b3   :  { %3480 = vmatprep.mubr.msk.bf16.mxu1 %vm3863_vm4, %v3862_v24 }
 0x5ba   :  { %3481 = vmatmul.mubr.msk.bf16.gmra.mxu1 %vm223_vm1, %v1462_v39 }
 0x5bb   :  { %3484 = vmatprep.mubr.msk.bf16.mxu1 %vm3863_vm4, %v3862_v24 }
 0x5c2   :  { %3485 = vmatmul.mubr.msk.bf16.gmra.mxu1 %vm223_vm1, %v1463_v45 }
 0x5c3   :  { %3488 = vmatprep.mubr.msk.bf16.mxu1 %vm3863_vm4, %v3862_v24 }
 0x5ca   :  { %3489 = vmatmul.mubr.msk.bf16.gmra.mxu1 %vm223_vm1, %v1464_v9 }
 0x5cb   :  { %3564 = vmatprep.mubr.msk.f32.mxu1 %vm3863_vm4, %v3862_v24 }
 0x642   :  { %v1297_v12 = vpop.f32.mrf.mxu1 }
 0x643   :  { %1304 = vst [vmem:[%s4908_s11] sm:$0xff] %v1297_v12 }
 0x644   :  { %v3432_v1 = vpop.f32.mrf.mxu1 }
 0x646   :  { %v1300_v26 = vpop.f32.mrf.mxu1 }
 0x647   :  { %1305 = vst [vmem:[%s4908_s11 + $0x8] sm:$0xff] %v1300_v26 }
 0x648   :  { %v3433_v52 = vpop.f32.mrf.mxu1 }
 0x64a   :  { %v1542_v3 = vpop.f32.mrf.mxu1 }
 0x64b   :  { %3494 = vmatprep.mubr.msk.f32.mxu0 %vm223_vm1, %v1542_v3 }
 0x64c   :  { %v3458_v29 = vpop.f32.mrf.mxu1 }
 0x64e   :  { %v1545_v31 = vpop.f32.mrf.mxu1 }
 0x64f   :  { %3495 = vmatmul.mubr.msk.f32.vlgmr.msra.gmra.mxu0 %vm223_vm1, %v1545_v31 }
 0x650   :  { %v3459_v14 = vpop.f32.mrf.mxu1  ;;  %3507 = vmatpush3.xpose.msk.msra.mxu0 %vm223_vm1, %v4502_v62 }
 0x651   :  { %3520 = vmatprep.subr.mxu0 %v3836_v57 }
 0x652   :  { %v1550_v30 = vpop.f32.mrf.mxu1 }
 0x653   :  { %3497 = vmatprep.mubr.msk.f32.mxu0 %vm223_vm1, %v1550_v30 }
 0x654   :  { %v3462_v59 = vpop.f32.mrf.mxu1 }
 0x656   :  { %v1553_v32 = vpop.f32.mrf.mxu1 }
 0x657   :  { %3498 = vmatmul.mubr.msk.f32.gmra.mxu0 %vm223_vm1, %v1553_v32 }
 0x658   :  { %v3463_v20 = vpop.f32.mrf.mxu1 }
 0x65a   :  { %v1558_v11 = vpop.f32.mrf.mxu1 }
 0x65b   :  { %3500 = vmatprep.mubr.msk.f32.mxu0 %vm223_vm1, %v1558_v11 }
 0x65c   :  { %v3466_v13 = vpop.f32.mrf.mxu1 }
 0x65e   :  { %v1561_v63 = vpop.f32.mrf.mxu1 }
 0x65f   :  { %3501 = vmatmul.mubr.msk.f32.gmra.mxu0 %vm223_vm1, %v1561_v63 }
 0x660   :  { %v3467_v0 = vpop.f32.mrf.mxu1 }
 0x662   :  { %v1566_v47 = vpop.f32.mrf.mxu1 }
 0x663   :  { %3503 = vmatprep.mubr.msk.f32.mxu0 %vm223_vm1, %v1566_v47 }
 0x664   :  { %v3470_v49 = vpop.f32.mrf.mxu1 }
 0x666   :  { %v1569_v50 = vpop.f32.mrf.mxu1 }
 0x667   :  { %3504 = vmatmul.mubr.msk.f32.gmra.mxu0 %vm223_vm1, %v1569_v50 }
 0x668   :  { %v3471_v4 = vpop.f32.mrf.mxu1 }
 0x66a   :  { %v1574_v48 = vpop.f32.mrf.mxu1 }
 0x66b   :  { %3508 = vmatprep.mubr.msk.f32.mxu0 %vm223_vm1, %v1574_v48 }
 0x66c   :  { %v3474_v23 = vpop.f32.mrf.mxu1 }
 0x66e   :  { %v1577_v43 = vpop.f32.mrf.mxu1 }
 0x66f   :  { %3509 = vmatmul.mubr.msk.f32.vlgmr.msra.gmra.mxu0 %vm223_vm1, %v1577_v43 }
 0x670   :  { %v3475_v25 = vpop.f32.mrf.mxu1  ;;  %3521 = vmatpush3.msra.mxu0 %v3836_v57 }
 0x671   :  { %3534 = vmatprep.subr.mxu0 %v4502_v62 }
 0x672   :  { %v1582_v41 = vpop.f32.mrf.mxu1 }
 0x673   :  { %3511 = vmatprep.mubr.msk.f32.mxu0 %vm223_vm1, %v1582_v41 }
 0x674   :  { %v3478_v5 = vpop.f32.mrf.mxu1 }
 0x676   :  { %v1585_v44 = vpop.f32.mrf.mxu1 }
 0x677   :  { %3512 = vmatmul.mubr.msk.f32.gmra.mxu0 %vm223_vm1, %v1585_v44 }
 0x678   :  { %v3479_v6 = vpop.f32.mrf.mxu1 }
 0x67a   :  { %v1590_v42 = vpop.f32.mrf.mxu1 }
 0x67b   :  { %3514 = vmatprep.mubr.msk.f32.mxu0 %vm223_vm1, %v1590_v42 }
 0x67c   :  { %v3482_v8 = vpop.f32.mrf.mxu1 }
 0x67e   :  { %v1593_v37 = vpop.f32.mrf.mxu1 }
 0x67f   :  { %3515 = vmatmul.mubr.msk.f32.gmra.mxu0 %vm223_vm1, %v1593_v37 }
 0x680   :  { %v3483_v35 = vpop.f32.mrf.mxu1 }
 0x682   :  { %v1598_v10 = vpop.f32.mrf.mxu1 }
 0x683   :  { %3517 = vmatprep.mubr.msk.f32.mxu0 %vm223_vm1, %v1598_v10 }
 0x684   :  { %v3486_v51 = vpop.f32.mrf.mxu1 }
 0x686   :  { %v1601_v54 = vpop.f32.mrf.mxu1 }
 0x687   :  { %3518 = vmatmul.mubr.msk.f32.gmra.mxu0 %vm223_vm1, %v1601_v54 }
 0x688   :  { %v3487_v53 = vpop.f32.mrf.mxu1 }
 0x68a   :  { %v1606_v28 = vpop.f32.mrf.mxu1 }
 0x68b   :  { %3565 = vmatmul.mubr.msk.f32.vlgmr.msra.gmra.mxu1 %vm223_vm1, %v1606_v28 }
 0x68c   :  { %3587 = vmatpush3.msra.mxu1 %v4413_v15  ;;  %v3490_v16 = vpop.f32.mrf.mxu1  ;;  %3602 = vmatprep.mubr.msk.f32.mxu1 %vm3863_vm4, %v3862_v24 }
 0x68d   :  { %3588 = vmatprep.subr.mxu1 %v3862_v24 }
 0x68e   :  { %3589 = vmatpush3.msra.mxu1 %v4400_v27 }
 0x68f   :  { %3590 = vmatprep.subr.mxu1 %v3862_v24 }
 0x690   :  { %3591 = vmatpush3.msra.mxu1 %v4426_v18 }
 0x691   :  { %3592 = vmatprep.subr.mxu1 %v3862_v24 }
 0x692   :  { %3593 = vmatpush3.msra.mxu1 %v4409_v55 }
 0x693   :  { %3594 = vmatprep.subr.mxu1 %v3862_v24 }
 0x694   :  { %3595 = vmatpush3.msra.mxu1 %v4389_v36 }
 0x695   :  { %3596 = vmatprep.subr.mxu1 %v3862_v24 }
 0x696   :  { %3597 = vmatpush3.msra.mxu1 %v4383_v2 }
 0x697   :  { %3598 = vmatprep.subr.mxu1 %v3862_v24 }
 0x698   :  { %3599 = vmatpush3.msra.mxu1 %v4395_v46 }
 0x699   :  { %3600 = vmatprep.subr.mxu1 %v3862_v24 }
 0x69a   :  { %3601 = vmatpush3.msra.mxu1 %v4386_v38 }
 0x69b   :  { %3624 = vmatprep.subr.bf16.mxu1 %v3862_v24 }
 0x70f   :  { %v3496_v58 = vpop.f32.mrf.mxu0 }
 0x710   :  { %v4552_v19 = vmul.f32 0.17677669, %v3496_v58 }
 0x711   :  { %v1703_v22 = vpop.f32.mrf.mxu0 }
 0x712   :  { %v4554_v33 = vmul.f32 0.17677669, %v1703_v22  ;;  %v1890_v39 = vsel %vm625_vm2, %v4552_v19, -inf }
 0x713   :  { %1891 = vmax.xlane.f32.xlu1 %v1890_v39  ;;  %v4616_v39 = vpop.f32.mrf.mxu1 }
 0x714   :  { %v1887_v45 = vsel %vm625_vm2, %v4554_v33, -inf }
 0x715   :  { %1888 = vmax.xlane.f32.xlu0 %v1887_v45  ;;  %v3491_v45 = vpop.f32.mrf.mxu1 }
 0x717   :  { %v3499_v57 = vpop.f32.mrf.mxu0 }
 0x718   :  { %v4560_v9 = vmul.f32 0.17677669, %v3499_v57 }
 0x719   :  { %v1713_v12 = vpop.f32.mrf.mxu0 }
 0x71a   :  { %v4562_v1 = vmul.f32 0.17677669, %v1713_v12  ;;  %v1896_v26 = vsel %vm625_vm2, %v4560_v9, -inf }
 0x71b   :  { %1897 = vmax.xlane.f32.xlu1 %v1896_v26 }
 0x71c   :  { %v1893_v52 = vsel %vm625_vm2, %v4562_v1, -inf }
 0x71d   :  { %1894 = vmax.xlane.f32.xlu0 %v1893_v52 }
 0x71f   :  { %v3502_v3 = vpop.f32.mrf.mxu0 }
 0x720   :  { %v4568_v29 = vmul.f32 0.17677669, %v3502_v3 }
 0x721   :  { %v1723_v31 = vpop.f32.mrf.mxu0 }
 0x722   :  { %v4570_v14 = vmul.f32 0.17677669, %v1723_v31  ;;  %v1902_v30 = vsel %vm625_vm2, %v4568_v29, -inf }
 0x723   :  { %1903 = vmax.xlane.f32.xlu1 %v1902_v30 }
 0x724   :  { %v1899_v59 = vsel %vm625_vm2, %v4570_v14, -inf }
 0x725   :  { %1900 = vmax.xlane.f32.xlu0 %v1899_v59 }
 0x727   :  { %v3505_v32 = vpop.f32.mrf.mxu0 }
 0x728   :  { %v4576_v20 = vmul.f32 0.17677669, %v3505_v32 }
 0x729   :  { %v1733_v11 = vpop.f32.mrf.mxu0 }
 0x72a   :  { %v4578_v13 = vmul.f32 0.17677669, %v1733_v11  ;;  %v1908_v63 = vsel %vm625_vm2, %v4576_v20, -inf }
 0x72b   :  { %1909 = vmax.xlane.f32.xlu1 %v1908_v63 }
 0x72c   :  { %v1905_v0 = vsel %vm625_vm2, %v4578_v13, -inf }
 0x72d   :  { %1906 = vmax.xlane.f32.xlu0 %v1905_v0 }
 0x72f   :  { %v3510_v47 = vpop.f32.mrf.mxu0 }
 0x730   :  { %v4584_v49 = vmul.f32 0.17677669, %v3510_v47 }
 0x731   :  { %v1832_v50 = vpop.f32.mrf.mxu0 }
 0x732   :  { %v4586_v4 = vmul.f32 0.17677669, %v1832_v50  ;;  %v1914_v48 = vsel %vm625_vm2, %v4584_v49, -inf }
 0x733   :  { %1915 = vmax.xlane.f32.xlu1 %v1914_v48 }
 0x734   :  { %v1911_v23 = vsel %vm625_vm2, %v4586_v4, -inf }
 0x735   :  { %1912 = vmax.xlane.f32.xlu0 %v1911_v23 }
 0x737   :  { %v3513_v43 = vpop.f32.mrf.mxu0 }
 0x738   :  { %v4592_v25 = vmul.f32 0.17677669, %v3513_v43 }
 0x739   :  { %v1842_v41 = vpop.f32.mrf.mxu0 }
 0x73a   :  { %v4594_v5 = vmul.f32 0.17677669, %v1842_v41  ;;  %v1920_v44 = vsel %vm625_vm2, %v4592_v25, -inf }
 0x73b   :  { %1921 = vmax.xlane.f32.xlu1 %v1920_v44 }
 0x73c   :  { %v1917_v6 = vsel %vm625_vm2, %v4594_v5, -inf }
 0x73d   :  { %1918 = vmax.xlane.f32.xlu0 %v1917_v6 }
 0x73f   :  { %v3516_v42 = vpop.f32.mrf.mxu0 }
 0x740   :  { %v4600_v8 = vmul.f32 0.17677669, %v3516_v42 }
 0x741   :  { %v1852_v37 = vpop.f32.mrf.mxu0 }
 0x742   :  { %v4602_v35 = vmul.f32 0.17677669, %v1852_v37  ;;  %v1926_v10 = vsel %vm625_vm2, %v4600_v8, -inf }
 0x743   :  { %1927 = vmax.xlane.f32.xlu1 %v1926_v10 }
 0x744   :  { %v1923_v51 = vsel %vm625_vm2, %v4602_v35, -inf }
 0x745   :  { %1924 = vmax.xlane.f32.xlu0 %v1923_v51 }
 0x747   :  { %v3519_v54 = vpop.f32.mrf.mxu0 }
 0x748   :  { %v4608_v53 = vmul.f32 0.17677669, %v3519_v54 }
 0x749   :  { %v1862_v28 = vpop.f32.mrf.mxu0 }
 0x74a   :  { %v4610_v16 = vmul.f32 0.17677669, %v1862_v28  ;;  %v1932_v58 = vsel %vm625_vm2, %v4608_v53, -inf }
 0x74b   :  { %1933 = vmax.xlane.f32.xlu1 %v1932_v58  ;;  %v4618_v57 = vpop.f32.mrf.mxu1 }
 0x74c   :  { %v1929_v22 = vsel %vm625_vm2, %v4610_v16, -inf }
 0x74d   :  { %1930 = vmax.xlane.f32.xlu0 %v1929_v22  ;;  %v3566_v12 = vpop.f32.mrf.mxu1 }
 0x79c   :  { %v1892_v26 = vpop.xlane.xlu1 %1891 }
 0x79d   :  { %v1936_v52 = vsub.f32 %v4552_v19, %v1892_v26 }
 0x79e   :  { %v1889_v3 = vpop.xlane.xlu0 %1888 }
 0x79f   :  { %v1953_v31 = vmul.f32 1.442695, %v1936_v52  ;;  %v1935_v30 = vsub.f32 %v4554_v33, %v1889_v3 }
 0x7a1   :  { %3764 = vpow2.f32 %v1953_v31  ;;  %v1951_v59 = vmul.f32 1.442695, %v1935_v30 }
 0x7a3   :  { %3766 = vpow2.f32 %v1951_v59 }
 0x7a4   :  { %v1898_v32 = vpop.xlane.xlu1 %1897 }
 0x7a5   :  { %v1938_v11 = vsub.f32 %v4560_v9, %v1898_v32 }
 0x7a6   :  { %v1895_v63 = vpop.xlane.xlu0 %1894 }
 0x7a7   :  { %v1957_v0 = vmul.f32 1.442695, %v1938_v11  ;;  %v1937_v47 = vsub.f32 %v4562_v1, %v1895_v63 }
 0x7a9   :  { %3768 = vpow2.f32 %v1957_v0  ;;  %v1955_v50 = vmul.f32 1.442695, %v1937_v47 }
 0x7ab   :  { %3770 = vpow2.f32 %v1955_v50 }
 0x7ac   :  { %v1904_v48 = vpop.xlane.xlu1 %1903 }
 0x7ad   :  { %v1940_v19 = vsub.f32 %v4568_v29, %v1904_v48 }
 0x7ae   :  { %v4625_v23 = vpop.eup %3764  ;;  %v1901_v43 = vpop.xlane.xlu0 %1900 }
 0x7af   :  { %v1961_v33 = vmul.f32 1.442695, %v1940_v19  ;;  %v1939_v41 = vsub.f32 %v4570_v14, %v1901_v43  ;;  %v1986_v44 = vsel %vm625_vm2, %v4625_v23, 0.0 }
 0x7b0   :  { %v4630_v9 = vpop.eup %3766  ;;  %1987 = vadd.xlane.f32.xlu1 %v1986_v44 }
 0x7b1   :  { %3772 = vpow2.f32 %v1961_v33  ;;  %v1959_v1 = vmul.f32 1.442695, %v1939_v41  ;;  %v1983_v6 = vsel %vm625_vm2, %v4630_v9, 0.0 }
 0x7b2   :  { %1984 = vadd.xlane.f32.xlu0 %v1983_v6 }
 0x7b3   :  { %3774 = vpow2.f32 %v1959_v1 }
 0x7b4   :  { %v1910_v29 = vpop.xlane.xlu1 %1909 }
 0x7b5   :  { %v1942_v42 = vsub.f32 %v4576_v20, %v1910_v29 }
 0x7b6   :  { %v4635_v37 = vpop.eup %3768  ;;  %v1907_v10 = vpop.xlane.xlu0 %1906 }
 0x7b7   :  { %v1965_v14 = vmul.f32 1.442695, %v1942_v42  ;;  %v1941_v51 = vsub.f32 %v4578_v13, %v1907_v10  ;;  %v1992_v54 = vsel %vm625_vm2, %v4635_v37, 0.0 }
 0x7b8   :  { %v4640_v28 = vpop.eup %3770  ;;  %1993 = vadd.xlane.f32.xlu1 %v1992_v54 }
 0x7b9   :  { %3776 = vpow2.f32 %v1965_v14  ;;  %v1963_v58 = vmul.f32 1.442695, %v1941_v51  ;;  %v1989_v22 = vsel %vm625_vm2, %v4640_v28, 0.0 }
 0x7ba   :  { %1990 = vadd.xlane.f32.xlu0 %v1989_v22 }
 0x7bb   :  { %3778 = vpow2.f32 %v1963_v58 }
 0x7bc   :  { %v1916_v20 = vpop.xlane.xlu1 %1915 }
 0x7bd   :  { %v1944_v45 = vsub.f32 %v4584_v49, %v1916_v20 }
 0x7be   :  { %v4645_v12 = vpop.eup %3772  ;;  %v1913_v26 = vpop.xlane.xlu0 %1912 }
 0x7bf   :  { %v1969_v13 = vmul.f32 1.442695, %v1944_v45  ;;  %v1943_v52 = vsub.f32 %v4586_v4, %v1913_v26  ;;  %v1998_v3 = vsel %vm625_vm2, %v4645_v12, 0.0 }
 0x7c0   :  { %v4650_v31 = vpop.eup %3774  ;;  %1999 = vadd.xlane.f32.xlu1 %v1998_v3 }
 0x7c1   :  { %3780 = vpow2.f32 %v1969_v13  ;;  %v1967_v30 = vmul.f32 1.442695, %v1943_v52  ;;  %v1995_v59 = vsel %vm625_vm2, %v4650_v31, 0.0 }
 0x7c2   :  { %1996 = vadd.xlane.f32.xlu0 %v1995_v59 }
 0x7c3   :  { %3782 = vpow2.f32 %v1967_v30  ;;  %v4697_v30 = vmul.f32 0.17677669, %v4618_v57 }
 0x7c4   :  { %v1922_v49 = vpop.xlane.xlu1 %1921 }
 0x7c5   :  { %v1946_v32 = vsub.f32 %v4592_v25, %v1922_v49 }
 0x7c6   :  { %v4655_v11 = vpop.eup %3776  ;;  %v1919_v63 = vpop.xlane.xlu0 %1918 }
 0x7c7   :  { %v1973_v4 = vmul.f32 1.442695, %v1946_v32  ;;  %v1945_v0 = vsub.f32 %v4594_v5, %v1919_v63  ;;  %v2004_v47 = vsel %vm625_vm2, %v4655_v11, 0.0  ;;  %v2518_v32 = vsel %vm2517_vm5, %v4697_v30, -inf }
 0x7c8   :  { %v4660_v50 = vpop.eup %3778  ;;  %2005 = vadd.xlane.f32.xlu1 %v2004_v47 }
 0x7c9   :  { %3784 = vpow2.f32 %v1973_v4  ;;  %v1971_v48 = vmul.f32 1.442695, %v1945_v0  ;;  %v2001_v19 = vsel %vm625_vm2, %v4660_v50, 0.0 }
 0x7ca   :  { %2002 = vadd.xlane.f32.xlu0 %v2001_v19 }
 0x7cb   :  { %3786 = vpow2.f32 %v1971_v48 }
 0x7cc   :  { %v1928_v25 = vpop.xlane.xlu1 %1927 }
 0x7cd   :  { %v1948_v43 = vsub.f32 %v4600_v8, %v1928_v25 }
 0x7ce   :  { %v4665_v33 = vpop.eup %3780  ;;  %v1925_v41 = vpop.xlane.xlu0 %1924 }
 0x7cf   :  { %v1977_v5 = vmul.f32 1.442695, %v1948_v43  ;;  %v1947_v44 = vsub.f32 %v4602_v35, %v1925_v41  ;;  %v2010_v1 = vsel %vm625_vm2, %v4665_v33, 0.0 }
 0x7d0   :  { %v4670_v6 = vpop.eup %3782  ;;  %2011 = vadd.xlane.f32.xlu1 %v2010_v1 }
 0x7d1   :  { %3788 = vpow2.f32 %v1977_v5  ;;  %v1975_v29 = vmul.f32 1.442695, %v1947_v44  ;;  %v2007_v42 = vsel %vm625_vm2, %v4670_v6, 0.0 }
 0x7d2   :  { %2008 = vadd.xlane.f32.xlu0 %v2007_v42 }
 0x7d3   :  { %3790 = vpow2.f32 %v1975_v29 }
 0x7d4   :  { %v1934_v8 = vpop.xlane.xlu1 %1933 }
 0x7d5   :  { %v1950_v10 = vsub.f32 %v4608_v53, %v1934_v8 }
 0x7d6   :  { %v4675_v14 = vpop.eup %3784  ;;  %v1931_v51 = vpop.xlane.xlu0 %1930 }
 0x7d7   :  { %v1981_v35 = vmul.f32 1.442695, %v1950_v10  ;;  %v1949_v54 = vsub.f32 %v4610_v16, %v1931_v51  ;;  %v2016_v58 = vsel %vm625_vm2, %v4675_v14, 0.0 }
 0x7d8   :  { %v4680_v22 = vpop.eup %3786  ;;  %2017 = vadd.xlane.f32.xlu1 %v2016_v58 }
 0x7d9   :  { %3792 = vpow2.f32 %v1981_v35  ;;  %v1979_v20 = vmul.f32 1.442695, %v1949_v54  ;;  %v2013_v45 = vsel %vm625_vm2, %v4680_v22, 0.0 }
 0x7da   :  { %2014 = vadd.xlane.f32.xlu0 %v2013_v45 }
 0x7db   :  { %3794 = vpow2.f32 %v1979_v20 }
 0x7de   :  { %v4684_v53 = vpop.eup %3788 }
 0x7df   :  { %v2022_v26 = vsel %vm625_vm2, %v4684_v53, 0.0 }
 0x7e0   :  { %v4688_v13 = vpop.eup %3790  ;;  %2023 = vadd.xlane.f32.xlu1 %v2022_v26 }
 0x7e1   :  { %v2019_v16 = vsel %vm625_vm2, %v4688_v13, 0.0 }
 0x7e2   :  { %2020 = vadd.xlane.f32.xlu0 %v2019_v16 }
 0x7e6   :  { %v4692_v52 = vpop.eup %3792 }
 0x7e7   :  { %v2028_v3 = vsel %vm625_vm2, %v4692_v52, 0.0 }
 0x7e8   :  { %v4699_v59 = vpop.eup %3794  ;;  %2029 = vadd.xlane.f32.xlu1 %v2028_v3 }
 0x7e9   :  { %v2025_v49 = vsel %vm625_vm2, %v4699_v59, 0.0 }
 0x7ea   :  { %2026 = vadd.xlane.f32.xlu0 %v2025_v49 }
 0x7ee   :  { %2519 = vmax.xlane.f32.xlu0 %v2518_v32 }
 0x839   :  { %v1988_v63 = vpop.xlane.xlu1 %1987 }
 0x83a   :  { %3796 = vrcp.f32 %v1988_v63 }
 0x83b   :  { %v1985_v4 = vpop.xlane.xlu0 %1984 }
 0x83c   :  { %3798 = vrcp.f32 %v1985_v4 }
 0x841   :  { %v1994_v0 = vpop.xlane.xlu1 %1993 }
 0x842   :  { %3800 = vrcp.f32 %v1994_v0 }
 0x843   :  { %v1991_v57 = vpop.xlane.xlu0 %1990 }
 0x844   :  { %3802 = vrcp.f32 %v1991_v57 }
 0x847   :  { %v3797_v47 = vpop.eup %3796 }
 0x848   :  { %v2048_v43 = vmul.f32 %v3797_v47, %v4625_v23 }
 0x849   :  { %v3799_v48 = vpop.eup %3798  ;;  %v2000_v19 = vpop.xlane.xlu1 %1999 }
 0x84a   :  { %v2047_v25 = vmul.f32 %v3799_v48, %v4630_v9  ;;  %3804 = vrcp.f32 %v2000_v19 }
 0x84b   :  { %v1997_v41 = vpop.xlane.xlu0 %1996 }
 0x84c   :  { %3806 = vrcp.f32 %v1997_v41  ;;  %3522 = vmatprep.mubr.msk.f32.mxu0 %vm625_vm2, %v2047_v25 }
 0x84d   :  { %3523 = vmatmul.mubr.msk.f32.vlgmr.msra.gmra.mxu0 %vm625_vm2, %v2048_v43 }
 0x84e   :  { %3535 = vmatpush3.msra.mxu0 %v4502_v62 }
 0x84f   :  { %3567 = vmatprep.subr.mxu0 %v3862_v24  ;;  %v3801_v5 = vpop.eup %3800 }
 0x850   :  { %v2050_v23 = vmul.f32 %v3801_v5, %v4635_v37  ;;  %v3698_v5 = vld [vmem:[%s4906_s9 + $0x8] sm:$0xff]  }
 0x851   :  { %v3803_v44 = vpop.eup %3802  ;;  %v2006_v1 = vpop.xlane.xlu1 %2005 }
 0x852   :  { %v2049_v29 = vmul.f32 %v3803_v44, %v4640_v28  ;;  %3808 = vrcp.f32 %v2006_v1 }
 0x853   :  { %v2003_v9 = vpop.xlane.xlu0 %2002 }
 0x854   :  { %3810 = vrcp.f32 %v2003_v9  ;;  %3525 = vmatprep.mubr.msk.f32.mxu0 %vm625_vm2, %v2049_v29  ;;  %v3699_v29 = vld [vmem:[%s4906_s9] sm:$0xff]  }
 0x855   :  { %3526 = vmatmul.mubr.msk.f32.gmra.mxu0 %vm625_vm2, %v2050_v23 }
 0x857   :  { %v3805_v42 = vpop.eup %3804 }
 0x858   :  { %v2052_v35 = vmul.f32 %v3805_v42, %v4645_v12 }
 0x859   :  { %v3807_v8 = vpop.eup %3806  ;;  %v2012_v10 = vpop.xlane.xlu1 %2011 }
 0x85a   :  { %v2051_v62 = vmul.f32 %v3807_v8, %v4650_v31  ;;  %3812 = vrcp.f32 %v2012_v10 }
 0x85b   :  { %v2009_v51 = vpop.xlane.xlu0 %2008 }
 0x85c   :  { %3814 = vrcp.f32 %v2009_v51  ;;  %3528 = vmatprep.mubr.msk.f32.mxu0 %vm625_vm2, %v2051_v62 }
 0x85d   :  { %3529 = vmatmul.mubr.msk.f32.gmra.mxu0 %vm625_vm2, %v2052_v35 }
 0x85f   :  { %v3809_v37 = vpop.eup %3808 }
 0x860   :  { %v2054_v45 = vmul.f32 %v3809_v37, %v4655_v11 }
 0x861   :  { %v3811_v28 = vpop.eup %3810  ;;  %v2018_v54 = vpop.xlane.xlu1 %2017 }
 0x862   :  { %v2053_v58 = vmul.f32 %v3811_v28, %v4660_v50  ;;  %3816 = vrcp.f32 %v2018_v54 }
 0x863   :  { %v2015_v20 = vpop.xlane.xlu0 %2014 }
 0x864   :  { %3818 = vrcp.f32 %v2015_v20  ;;  %3531 = vmatprep.mubr.msk.f32.mxu0 %vm625_vm2, %v2053_v58 }
 0x865   :  { %3532 = vmatmul.mubr.msk.f32.gmra.mxu0 %vm625_vm2, %v2054_v45 }
 0x867   :  { %v3813_v12 = vpop.eup %3812 }
 0x868   :  { %v2056_v3 = vmul.f32 %v3813_v12, %v4665_v33 }
 0x869   :  { %v3815_v31 = vpop.eup %3814  ;;  %v2024_v26 = vpop.xlane.xlu1 %2023 }
 0x86a   :  { %v2055_v16 = vmul.f32 %v3815_v31, %v4670_v6  ;;  %3820 = vrcp.f32 %v2024_v26 }
 0x86b   :  { %v2021_v49 = vpop.xlane.xlu0 %2020 }
 0x86c   :  { %3822 = vrcp.f32 %v2021_v49  ;;  %3536 = vmatprep.mubr.msk.f32.mxu0 %vm625_vm2, %v2055_v16 }
 0x86d   :  { %3537 = vmatmul.mubr.msk.f32.vlgmr.msra.gmra.mxu0 %vm625_vm2, %v2056_v3 }
 0x86e   :  { %3568 = vmatpush3.xpose.msk.msra.mxu0 %vm223_vm1, %v4479_v34 }
 0x86f   :  { %3569 = vmatprep.subr.mxu0 %v3862_v24  ;;  %v3817_v11 = vpop.eup %3816 }
 0x870   :  { %v2058_v63 = vmul.f32 %v3817_v11, %v4675_v14 }
 0x871   :  { %v3819_v50 = vpop.eup %3818  ;;  %v2030_v32 = vpop.xlane.xlu1 %2029 }
 0x872   :  { %3570 = vmatpush3.xpose.msk.msra.mxu0 %vm223_vm1, %v4470_v56  ;;  %v2057_v33 = vmul.f32 %v3819_v50, %v4680_v22  ;;  %3824 = vrcp.f32 %v2030_v32 }
 0x873   :  { %v2027_v6 = vpop.xlane.xlu0 %2026  ;;  %3571 = vmatprep.subr.mxu0 %v3862_v24 }
 0x874   :  { %3826 = vrcp.f32 %v2027_v6  ;;  %3539 = vmatprep.mubr.msk.f32.mxu0 %vm625_vm2, %v2057_v33 }
 0x875   :  { %3540 = vmatmul.mubr.msk.f32.gmra.mxu0 %vm625_vm2, %v2058_v63 }
 0x876   :  { %3572 = vmatpush3.xpose.msk.msra.mxu0 %vm223_vm1, %v4484_v7 }
 0x877   :  { %v2520_v4 = vpop.xlane.xlu0 %2519  ;;  %3573 = vmatprep.subr.mxu0 %v3862_v24  ;;  %v3821_v0 = vpop.eup %3820 }
 0x878   :  { %v2524_v22 = vsub.f32 %v4697_v30, %v2520_v4  ;;  %v2060_v48 = vmul.f32 %v3821_v0, %v4684_v53 }
 0x879   :  { %v3823_v57 = vpop.eup %3822 }
 0x87a   :  { %v2526_v47 = vmul.f32 1.442695, %v2524_v22  ;;  %3574 = vmatpush3.xpose.msk.msra.mxu0 %vm223_vm1, %v4475_v60  ;;  %v2059_v14 = vmul.f32 %v3823_v57, %v4688_v13 }
 0x87b   :  { %3575 = vmatprep.subr.mxu0 %v3862_v24 }
 0x87c   :  { %3828 = vpow2.f32 %v2526_v47  ;;  %3542 = vmatprep.mubr.msk.f32.mxu0 %vm625_vm2, %v2059_v14 }
 0x87d   :  { %3543 = vmatmul.mubr.msk.f32.gmra.mxu0 %vm625_vm2, %v2060_v48 }
 0x87e   :  { %3576 = vmatpush3.xpose.msk.msra.mxu0 %vm223_vm1, %v4455_v21 }
 0x87f   :  { %3577 = vmatprep.subr.mxu0 %v3862_v24  ;;  %v3825_v30 = vpop.eup %3824 }
 0x880   :  { %v2062_v53 = vmul.f32 %v3825_v30, %v4692_v52 }
 0x881   :  { %v3827_v19 = vpop.eup %3826 }
 0x882   :  { %3578 = vmatpush3.xpose.msk.msra.mxu0 %vm223_vm1, %v4440_v61  ;;  %v2061_v13 = vmul.f32 %v3827_v19, %v4699_v59 }
 0x883   :  { %3579 = vmatprep.subr.mxu0 %v3862_v24 }
 0x884   :  { %3545 = vmatprep.mubr.msk.f32.mxu0 %vm625_vm2, %v2061_v13 }
 0x885   :  { %3546 = vmatmul.mubr.msk.f32.gmra.mxu0 %vm625_vm2, %v2062_v53 }
 0x886   :  { %3580 = vmatpush3.xpose.msk.msra.mxu0 %vm223_vm1, %v4463_v40  ;;  %3583 = vmatprep.mubr.msk.f32.mxu0 %vm3863_vm4, %v3862_v24 }
 0x887   :  { %3581 = vmatprep.subr.mxu0 %v3862_v24 }
 0x889   :  { %v3829_v25 = vpop.eup %3828 }
 0x88a   :  { %3582 = vmatpush3.xpose.msk.msra.mxu0 %vm223_vm1, %v4448_v17  ;;  %v2530_v59 = vsel %vm2517_vm5, %v3829_v25, 0.0 }
 0x88b   :  { %2531 = vadd.xlane.f32.xlu1 %v2530_v59  ;;  %3605 = vmatprep.subr.mxu0 %v3862_v24 }
 0x88d   :  { %3584 = vmatmul.mubr.msk.f32.vlgmr.msra.gmra.mxu0 %vm223_vm1, %v4616_v39 }
 0x88e   :  { %3606 = vmatpush3.msra.mxu0 %v4479_v34  ;;  %3621 = vmatprep.mubr.msk.f32.mxu0 %vm3863_vm4, %v3862_v24 }
 0x88f   :  { %3607 = vmatprep.subr.mxu0 %v3862_v24 }
 0x890   :  { %3608 = vmatpush3.msra.mxu0 %v4470_v56 }
 0x891   :  { %3609 = vmatprep.subr.mxu0 %v3862_v24 }
 0x892   :  { %3610 = vmatpush3.msra.mxu0 %v4484_v7 }
 0x893   :  { %3611 = vmatprep.subr.mxu0 %v3862_v24 }
 0x894   :  { %3612 = vmatpush3.msra.mxu0 %v4475_v60 }
 0x895   :  { %3613 = vmatprep.subr.mxu0 %v3862_v24 }
 0x896   :  { %3614 = vmatpush3.msra.mxu0 %v4455_v21 }
 0x897   :  { %3615 = vmatprep.subr.mxu0 %v3862_v24 }
 0x898   :  { %3616 = vmatpush3.msra.mxu0 %v4440_v61 }
 0x899   :  { %3617 = vmatprep.subr.mxu0 %v3862_v24 }
 0x89a   :  { %3618 = vmatpush3.msra.mxu0 %v4463_v40 }
 0x89b   :  { %3619 = vmatprep.subr.mxu0 %v3862_v24 }
 0x89c   :  { %3620 = vmatpush3.msra.mxu0 %v4448_v17 }
 0x89d   :  { %3664 = vmatprep.subr.bf16.mxu0 %v3862_v24 }
 0x90d   :  { %v3524_v52 = vpop.f32.mrf.mxu0 }
 0x90f   :  { %v2153_v43 = vpop.f32.mrf.mxu0 }
 0x910   :  { %v2686_v42 = vpack.c.bf16 %v3524_v52, %v2153_v43 }
 0x914   :  { %v2532_v39 = vpop.xlane.xlu1 %2531 }
 0x915   :  { %3830 = vrcp.f32 %v2532_v39  ;;  %v3527_v44 = vpop.f32.mrf.mxu0 }
 0x917   :  { %v2163_v9 = vpop.f32.mrf.mxu0 }
 0x918   :  { %v2687_v62 = vpack.c.bf16 %v3527_v44, %v2163_v9 }
 0x91d   :  { %v3530_v23 = vpop.f32.mrf.mxu0 }
 0x91f   :  { %v2173_v8 = vpop.f32.mrf.mxu0 }
 0x920   :  { %v2688_v28 = vpack.c.bf16 %v3530_v23, %v2173_v8 }
 0x922   :  { %v3831_v41 = vpop.eup %3830 }
 0x923   :  { %v2538_v1 = vmul.f32 %v3831_v41, %v3829_v25 }
 0x925   :  { %3603 = vmatmul.mubr.msk.f32.vlgmr.msra.gmra.mxu1 %vm2517_vm5, %v2538_v1  ;;  %v3533_v10 = vpop.f32.mrf.mxu0 }
 0x926   :  { %3625 = vmatpush3.bf16.msra.mxu1 %v3698_v5  ;;  %3628 = vmatprep.mubr.msk.bf16.mxu1 %vm3863_vm4, %v3862_v24 }
 0x927   :  { %3626 = vmatprep.subr.bf16.mxu1 %v3862_v24  ;;  %v2183_v51 = vpop.f32.mrf.mxu0 }
 0x928   :  { %v2689_v45 = vpack.c.bf16 %v3533_v10, %v2183_v51 }
 0x92a   :  { %3627 = vmatpush3.bf16.msra.mxu1 %v3699_v29 }
 0x92d   :  { %3629 = vmatmul.mubr.msk.bf16.vlgmr.msra.gmra.mxu1 %vm223_vm1, %v2686_v42  ;;  %v3538_v35 = vpop.f32.mrf.mxu0 }
 0x92e   :  { %3632 = vmatprep.mubr.msk.bf16.mxu1 %vm3863_vm4, %v3862_v24 }
 0x92f   :  { %v2282_v37 = vpop.f32.mrf.mxu0 }
 0x930   :  { %v2690_v26 = vpack.c.bf16 %v3538_v35, %v2282_v37 }
 0x935   :  { %3633 = vmatmul.mubr.msk.bf16.gmra.mxu1 %vm223_vm1, %v2687_v62  ;;  %v3541_v54 = vpop.f32.mrf.mxu0 }
 0x936   :  { %3636 = vmatprep.mubr.msk.bf16.mxu1 %vm3863_vm4, %v3862_v24 }
 0x937   :  { %v2292_v58 = vpop.f32.mrf.mxu0 }
 0x938   :  { %v2691_v32 = vpack.c.bf16 %v3541_v54, %v2292_v58 }
 0x93d   :  { %3637 = vmatmul.mubr.msk.bf16.gmra.mxu1 %vm223_vm1, %v2688_v28  ;;  %v3544_v20 = vpop.f32.mrf.mxu0 }
 0x93e   :  { %3640 = vmatprep.mubr.msk.bf16.mxu1 %vm3863_vm4, %v3862_v24 }
 0x93f   :  { %v2302_v12 = vpop.f32.mrf.mxu0 }
 0x940   :  { %v2692_v33 = vpack.c.bf16 %v3544_v20, %v2302_v12 }
 0x945   :  { %3641 = vmatmul.mubr.msk.bf16.gmra.mxu1 %vm223_vm1, %v2689_v45  ;;  %v3547_v31 = vpop.f32.mrf.mxu0 }
 0x946   :  { %3644 = vmatprep.mubr.msk.bf16.mxu1 %vm3863_vm4, %v3862_v24 }
 0x947   :  { %v2312_v16 = vpop.f32.mrf.mxu0 }
 0x948   :  { %v2693_v6 = vpack.c.bf16 %v3547_v31, %v2312_v16 }
 0x94d   :  { %v2511_v3 = vpop.f32.mrf.mxu0  ;;  %3645 = vmatmul.mubr.msk.bf16.gmra.mxu1 %vm223_vm1, %v2690_v26 }
 0x94e   :  { %v2516_v49 = vmul.f32 0.17677669, %v2511_v3  ;;  %3648 = vmatprep.mubr.msk.bf16.mxu1 %vm3863_vm4, %v3862_v24 }
 0x94f   :  { %v3585_v11 = vpop.f32.mrf.mxu0 }
 0x950   :  { %v2521_v50 = vsel %vm2517_vm5, %v2516_v49, -inf }
 0x951   :  { %2522 = vmax.xlane.f32.xlu0 %v2521_v50 }
 0x955   :  { %3649 = vmatmul.mubr.msk.bf16.gmra.mxu1 %vm223_vm1, %v2691_v32 }
 0x956   :  { %3652 = vmatprep.mubr.msk.bf16.mxu1 %vm3863_vm4, %v3862_v24 }
 0x95d   :  { %3653 = vmatmul.mubr.msk.bf16.gmra.mxu1 %vm223_vm1, %v2692_v33 }
 0x95e   :  { %3656 = vmatprep.mubr.msk.bf16.mxu1 %vm3863_vm4, %v3862_v24 }
 0x965   :  { %3657 = vmatmul.mubr.msk.bf16.gmra.mxu1 %vm223_vm1, %v2693_v6 }
 0x966   :  { %3660 = vmatprep.mubr.msk.bf16.mxu1 %vm3863_vm4, %v3862_v24 }
 0x9da   :  { %v2523_v63 = vpop.xlane.xlu0 %2522 }
 0x9db   :  { %v2525_v4 = vsub.f32 %v2516_v49, %v2523_v63 }
 0x9dd   :  { %v2528_v0 = vmul.f32 1.442695, %v2525_v4 }
 0x9df   :  { %3832 = vpow2.f32 %v2528_v0 }
 0x9e5   :  { %v4822_v22 = vpop.f32.mrf.mxu1 }
 0x9e7   :  { %v3604_v57 = vpop.f32.mrf.mxu1 }
 0x9ec   :  { %v3833_v47 = vpop.eup %3832 }
 0x9ed   :  { %v2772_v14 = vpop.f32.mrf.mxu1  ;;  %v2533_v48 = vsel %vm2517_vm5, %v3833_v47, 0.0 }
 0x9ee   :  { %2534 = vadd.xlane.f32.xlu1 %v2533_v48  ;;  %v4826_v13 = vadd.f32 %v2772_v14, %v4386_v38 }
 0x9ef   :  { %v3630_v30 = vpop.f32.mrf.mxu1 }
 0x9f1   :  { %v2775_v19 = vpop.f32.mrf.mxu1 }
 0x9f2   :  { %v4829_v53 = vadd.f32 %v2775_v19, %v4395_v46 }
 0x9f3   :  { %v3631_v25 = vpop.f32.mrf.mxu1 }
 0x9f4   :  { %v2864_v59 = vpack.c.bf16 %v4829_v53, %v4826_v13 }
 0x9f5   :  { %v2780_v39 = vpop.f32.mrf.mxu1 }
 0x9f6   :  { %v4834_v41 = vadd.f32 %v4383_v2, %v2780_v39  ;;  %v2876_v39 = vsel %vm223_vm1, %v2864_v59, 0 }
 0x9f7   :  { %v3634_v52 = vpop.f32.mrf.mxu1 }
 0x9f8   :  { %v2863_v52 = vld [vmem:[%s4907_s10] sm:$0xf]  ;;  %s3864_s10 = smov [#allocation2]  }
 0x9f9   :  { %v2783_v43 = vpop.f32.mrf.mxu1  ;;  %s2949_s22 = sshll.u32 %s3864_s10, 4  ;;  %s2950_s22 = int_to_ptr.vmem [resolvable:$true] %s2949_s22 }
 0x9fa   :  { %v4837_v5 = vadd.f32 %v4389_v36, %v2783_v43  ;;  %p3845_p1 = scmp.lt.s32.totalorder %s2950_s22, %s2950_s22 }
 0x9fb   :  { %v3635_v44 = vpop.f32.mrf.mxu1 }
 0x9fc   :  { %v2865_v38 = vpack.c.bf16 %v4837_v5, %v4834_v41 }
 0x9fd   :  { %v2788_v1 = vpop.f32.mrf.mxu1 }
 0x9fe   :  { %v2847_v9 = vadd.f32 %v2788_v1, %v4409_v55  ;;  %v2879_v25 = vsel %vm223_vm1, %v2865_v38, 0  ;;  %v3838_v38 = vld [vmem:[%s4897_s0] sm:$0xff] }
 0x9ff   :  { %v3638_v46 = vpop.f32.mrf.mxu1 }
 0xa01   :  { %v2791_v29 = vpop.f32.mrf.mxu1 }
 0xa02   :  { %v2848_v23 = vadd.f32 %v2791_v29, %v4426_v18  ;;  %v3839_v29 = vld [vmem:[%s4897_s0 + $0x8] sm:$0xff] }
 0xa03   :  { %v3639_v42 = vpop.f32.mrf.mxu1 }
 0xa04   :  { %v2866_v8 = vpack.c.bf16 %v2848_v23, %v2847_v9 }
 0xa05   :  { %v2796_v10 = vpop.f32.mrf.mxu1 }
 0xa06   :  { %v2849_v51 = vadd.f32 %v4400_v27, %v2796_v10  ;;  %v2882_v19 = vsel %vm223_vm1, %v2866_v8, 0 }
 0xa07   :  { %v3642_v62 = vpop.f32.mrf.mxu1 }
 0xa09   :  { %v2799_v2 = vpop.f32.mrf.mxu1 }
 0xa0a   :  { %v2850_v36 = vadd.f32 %v4413_v15, %v2799_v2 }
 0xa0b   :  { %v3643_v35 = vpop.f32.mrf.mxu1 }
 0xa0c   :  { %v2867_v37 = vpack.c.bf16 %v2850_v36, %v2849_v51 }
 0xa0d   :  { %v2804_v28 = vpop.f32.mrf.mxu1 }
 0xa0e   :  { %v2851_v20 = vadd.f32 %v2804_v28, %v4448_v17 }
 0xa0f   :  { %v3646_v54 = vpop.f32.mrf.mxu1 }
 0xa11   :  { %v2807_v58 = vpop.f32.mrf.mxu1 }
 0xa12   :  { %v2852_v55 = vadd.f32 %v2807_v58, %v4463_v40 }
 0xa13   :  { %v3647_v45 = vpop.f32.mrf.mxu1 }
 0xa14   :  { %v2868_v18 = vpack.c.bf16 %v2852_v55, %v2851_v20 }
 0xa15   :  { %v2812_v12 = vpop.f32.mrf.mxu1 }
 0xa16   :  { %v2853_v16 = vadd.f32 %v4440_v61, %v2812_v12 }
 0xa17   :  { %v3650_v31 = vpop.f32.mrf.mxu1 }
 0xa19   :  { %v2815_v26 = vpop.f32.mrf.mxu1 }
 0xa1a   :  { %v2854_v27 = vadd.f32 %v4455_v21, %v2815_v26 }
 0xa1b   :  { %v3651_v3 = vpop.f32.mrf.mxu1 }
 0xa1c   :  { %v2869_v15 = vpack.c.bf16 %v2854_v27, %v2853_v16 }
 0xa1d   :  { %v2820_v49 = vpop.f32.mrf.mxu1 }
 0xa1e   :  { %v2855_v32 = vadd.f32 %v2820_v49, %v4475_v60 }
 0xa1f   :  { %v3654_v11 = vpop.f32.mrf.mxu1 }
 0xa21   :  { %v2823_v50 = vpop.f32.mrf.mxu1 }
 0xa22   :  { %v2856_v17 = vadd.f32 %v2823_v50, %v4484_v7  ;;  %v2888_v7 = vsel %vm223_vm1, %v2868_v18, 0 }
 0xa23   :  { %v3655_v33 = vpop.f32.mrf.mxu1 }
 0xa24   :  { %v2870_v40 = vpack.c.bf16 %v2856_v17, %v2855_v32 }
 0xa25   :  { %v2828_v6 = vpop.f32.mrf.mxu1 }
 0xa26   :  { %v2857_v0 = vadd.f32 %v4470_v56, %v2828_v6  ;;  %v2894_v56 = vsel %vm223_vm1, %v2870_v40, 0 }
 0xa27   :  { %v3658_v63 = vpop.f32.mrf.mxu1 }
 0xa29   :  { %v2831_v4 = vpop.f32.mrf.mxu1 }
 0xa2a   :  { %v2858_v61 = vadd.f32 %v4479_v34, %v2831_v4  ;;  %v2891_v34 = vsel %vm223_vm1, %v2869_v15, 0 }
 0xa2b   :  { %v3659_v57 = vpop.f32.mrf.mxu1 }
 0xa2c   :  { %v2871_v21 = vpack.c.bf16 %v2858_v61, %v2857_v0 }
 0xa2e   :  { %v2897_v60 = vsel %vm223_vm1, %v2871_v21, 0 }
 0xa77   :  { %v2535_v14 = vpop.xlane.xlu1 %2534 }
 0xa78   :  { %3834 = vrcp.f32 %v2535_v14 }
 0xa85   :  { %v3835_v48 = vpop.eup %3834 }
 0xa86   :  { %v2539_v30 = vmul.f32 %v3835_v48, %v3833_v47  ;;  %v2885_v47 = vsel %vm223_vm1, %v2867_v37, 0 }
 0xa88   :  { %3622 = vmatmul.mubr.msk.f32.vlgmr.msra.gmra.mxu0 %vm2517_vm5, %v2539_v30 }
 0xa89   :  { %3665 = vmatpush3.bf16.xpose.msra.mxu0 %v2897_v60  ;;  %3680 = vmatprep.mubr.msk.bf16.mxu0 %vm3863_vm4, %v3862_v24 }
 0xa8a   :  { %3666 = vmatprep.subr.bf16.mxu0 %v3862_v24 }
 0xa91   :  { %3667 = vmatpush3.bf16.xpose.msra.mxu0 %v2894_v56 }
 0xa92   :  { %3668 = vmatprep.subr.bf16.mxu0 %v3862_v24 }
 0xa99   :  { %3669 = vmatpush3.bf16.xpose.msra.mxu0 %v2891_v34 }
 0xa9a   :  { %3670 = vmatprep.subr.bf16.mxu0 %v3862_v24 }
 0xaa1   :  { %3671 = vmatpush3.bf16.xpose.msra.mxu0 %v2888_v7 }
 0xaa2   :  { %3672 = vmatprep.subr.bf16.mxu0 %v3862_v24 }
 0xaa9   :  { %3673 = vmatpush3.bf16.xpose.msra.mxu0 %v2885_v47 }
 0xaaa   :  { %3674 = vmatprep.subr.bf16.mxu0 %v3862_v24 }
 0xab1   :  { %3675 = vmatpush3.bf16.xpose.msra.mxu0 %v2882_v19 }
 0xab2   :  { %3676 = vmatprep.subr.bf16.mxu0 %v3862_v24 }
 0xab9   :  { %3677 = vmatpush3.bf16.xpose.msra.mxu0 %v2879_v25 }
 0xaba   :  { %3678 = vmatprep.subr.bf16.mxu0 %v3862_v24 }
 0xac1   :  { %3679 = vmatpush3.bf16.xpose.msra.mxu0 %v2876_v39 }
 0xac8   :  { %3681 = vmatmul.mubr.msk.bf16.vlgmr.msra.gmra.mxu0 %vm223_vm1, %v2863_v52 }
 0xb48   :  { %v2682_v43 = vpop.f32.mrf.mxu0 }
 0xb49   :  { %v2694_v41 = vpack.c.bf16 %v2682_v43, %v4822_v22 }
 0xb4a   :  { %v3623_v5 = vpop.f32.mrf.mxu0 }
 0xb4b   :  { %3661 = vmatmul.mubr.msk.bf16.gmra.mxu1 %vm223_vm1, %v2694_v41 }
 0xb88   :  { %v2933_v44 = vpop.f32.mrf.mxu0 }
 0xb89   :  { %2939 = vst [vmem:[%s4909_s12] sm:$0xff] %v2933_v44  ;;  %s3840_s12 = scalar_lea.vmem %s2950_s22, 256 }
 0xb8a   :  { %v3682_v24 = vpop.f32.mrf.mxu0  ;;  %p3841_p0 = scmp.ne.s32.totalorder %s2950_s22, %s3840_s12  ;;  %p3846_p2 = scmp.lt.s32.totalorder %s3840_s12, %s3840_s12 }
 0xb8c   :  { %v2936_v13 = vpop.f32.mrf.mxu0  ;;  %p3847_p3 = por %p3846_p2, %p3845_p1 }
 0xb8e   :  { %v3683_v53 = vpop.f32.mrf.mxu0  ;;  %p3848_p4 = pnand %p3847_p3, %p3841_p0 }
 0xc0b   :  { %v2836_v59 = vpop.f32.mrf.mxu1 }
 0xc0c   :  { %v2859_v1 = vadd.f32 %v3838_v38, %v2836_v59 }
 0xc0d   :  { %v3662_v46 = vpop.f32.mrf.mxu1 }
 0xc0e   :  { %2861 = vst.msk [vmem:[#allocation2] sm:$0xff] %vm223_vm1, %v2859_v1 }
 0xc0f   :  { %v2839_v22 = vpop.f32.mrf.mxu1 }
 0xc10   :  { %v2860_v9 = vadd.f32 %v3839_v29, %v2839_v22 }
 0xc11   :  { %v3663_v23 = vpop.f32.mrf.mxu1 }
 0xc12   :  { %2862 = vst.msk [vmem:[#allocation2 + $0x8] sm:$0xff] %vm223_vm1, %v2860_v9 }
 0xc13   :  { %3851 = shalt.err (!%p3848_p4)
}
 0xc14   :  { %s3865_s6 = smov 128   ;;  %s3866_s25 = smov 8  }
 0xc15   :  { %2955 = dma.vmem_to_hbm [thread:$0]  %s2950_s22, 256, %s4910_s13, [#allocation3], %s3865_s6, %s3865_s6, %s3866_s25  }
 0xc16   :  { %3860 = dma.done.wait [#allocation3], 256  }
 0xc17   :  { %3861 = vsyncadd [#allocation3], 4294967040 }
 0xc18   :  { %2963 = vsyncpa [#allocation3], 1 }

</bundles_post_ra>
